<compile_context>
chip_gen: v6e
topology: v6e:2x2x1
jax: 0.10.0
libtpu: 0.0.40
codegen_flags: <defaults>
</compile_context>

<pallas_src>
import functools
import math

import jax
import jax.numpy as jnp
from jax import lax
from jax.experimental import pallas as pl
from jax.experimental.pallas import tpu as pltpu

EPS = 1e-5


# --------------------------------- helpers --------------------------------- #

def _patchify(t, p):
    """(B, C, H, W) -> (B, Hp*Wp, C*p*p); rows = patches, cols = (c, u, v)."""
    B, C, H, W = t.shape
    Hp, Wp = H // p, W // p
    t = t.reshape(B, C, Hp, p, Wp, p)
    t = t.transpose(0, 2, 4, 1, 3, 5)
    return t.reshape(B, Hp * Wp, C * p * p)


def _psum(a):
    """(TB, N, L) -> (TB, 1, 1): lane reduce then sublane reduce, per sample."""
    return jnp.sum(jnp.sum(a, axis=-1, keepdims=True), axis=-2, keepdims=True)


def _inv_sqrt_cov(vrr, vii, vri):
    """Entries of the inverse matrix sqrt of [[vrr, vri], [vri, vii]] (per sample)."""
    det = vrr * vii - vri * vri
    s = jnp.sqrt(det)
    inv_st = lax.rsqrt(det * (vrr + vii + 2.0 * s))   # 1/(s*t) on the EUP
    rrr = (vii + s) * inv_st
    rii = (vrr + s) * inv_st
    rri = -vri * inv_st
    return rrr, rii, rri


def _swap_halves(a, half):
    """Swap the [re | im] lane halves of a (..., 2*half) tile via an XLU roll."""
    TB, N, L = a.shape
    a2 = a.reshape(TB * N, L)
    return pltpu.roll(a2, shift=half, axis=1).reshape(TB, N, L)


def _choose_block_batch(B, N, target_rows=256):
    """Samples per grid step: fill the MXU M-dim but keep >= 2 grid steps (v7x)."""
    cands = [tb for tb in range(1, B + 1)
             if B % tb == 0 and (B // tb >= 2 or B == 1)]
    good = [tb for tb in cands if tb * N <= target_rows]
    return max(good) if good else min(cands)


# ------------------------------- Pallas kernel ------------------------------ #

def _patch_embed_kernel(x_ref, g1_ref, w_ref, b_ref, g2_ref, o_ref, *, K, D, Dp):
    """Fused LN1 -> packed complex conv (1 bf16 dot) -> LN2(+RoPE) for TB samples.

    x_ref : (TB, N, 2K)   packed [re-features | im-features] per patch row
    g1_ref: (3, N, 2K)    [ [grr|gii], [gri|gri], [beta_r|beta_i] ] for LN1
    w_ref : (2K, 2Dp)     bf16 packed conv weights (real cols 0:Dp, imag Dp:2Dp)
    b_ref : (1, 2Dp)      packed conv bias [b_re | b_im], zero in padded lanes
    g2_ref: (3, N, 2Dp)   [ [grr|gii], [gri|gri], [beta_r+rope_r | beta_i+rope_i] ]
    o_ref : (TB, N, 2Dp)  packed output (lane-dense; wrapper slices the D columns)
    """
    TB, N, K2 = x_ref.shape
    Dp2 = o_ref.shape[-1]
    x = x_ref[...]

    lane1 = lax.broadcasted_iota(jnp.int32, (1, K2), 1)
    mL1 = (lane1 < K).astype(jnp.float32)              # real half of the 2K packing
    lane2 = lax.broadcasted_iota(jnp.int32, (1, Dp2), 1)
    mL2 = (lane2 < Dp).astype(jnp.float32)              # real half of the 2Dp packing

    # ---- LN1: whitening complex LayerNorm over C*H*W, per sample ----
    inv_n1 = 1.0 / float(N * K)
    s_all = _psum(x)
    s_r = _psum(x * mL1)
    mu_r = s_r * inv_n1
    mu_i = (s_all - s_r) * inv_n1
    mu = mu_r * mL1 + mu_i * (1.0 - mL1)                 # (TB, 1, 2K)
    d = x - mu
    d_sw = _swap_halves(d, K)                            # [di | dr]
    dd = d * d
    s_dd = _psum(dd)
    s_ddr = _psum(dd * mL1)
    vrr = s_ddr * inv_n1 + EPS
    vii = (s_dd - s_ddr) * inv_n1 + EPS
    vri = 0.5 * _psum(d * d_sw) * inv_n1
    rrr, rii, rri = _inv_sqrt_cov(vrr, vii, vri)
    diag = rrr * mL1 + rii * (1.0 - mL1)
    xh = diag * d + rri * d_sw
    xh_sw = _swap_halves(xh, K)
    y = g1_ref[0] * xh + g1_ref[1] * xh_sw + g1_ref[2]   # (TB, N, 2K)

    # ---- patch conv: ONE bf16 MXU dot (contraction 2K, output 2Dp lanes) ----
    y2 = y.reshape(TB * N, K2).astype(jnp.bfloat16)
    c = jnp.dot(y2, w_ref[...], preferred_element_type=jnp.float32)
    c = c.reshape(TB, N, Dp2) + b_ref[...]               # padded lanes stay exactly 0

    # ---- LN2 over the D valid columns per half (+RoPE folded into the bias) ----
    inv_n2 = 1.0 / float(N * D)
    s_c = _psum(c)                                       # no valid-mask: pads are 0
    s_cr = _psum(c * mL2)
    mu_r2 = s_cr * inv_n2
    mu_i2 = (s_c - s_cr) * inv_n2
    mu2 = mu_r2 * mL2 + mu_i2 * (1.0 - mL2)
    d2 = c - mu2
    if D != Dp:                                          # zero the padded lanes once
        mV2 = ((lane2 % Dp) < D).astype(jnp.float32)
        d2 = d2 * mV2
    d2_sw = _swap_halves(d2, Dp)
    dd2 = d2 * d2
    s2 = _psum(dd2)
    s2r = _psum(dd2 * mL2)
    vrr2 = s2r * inv_n2 + EPS
    vii2 = (s2 - s2r) * inv_n2 + EPS
    vri2 = 0.5 * _psum(d2 * d2_sw) * inv_n2
    rrr2, rii2, rri2 = _inv_sqrt_cov(vrr2, vii2, vri2)
    diag2 = rrr2 * mL2 + rii2 * (1.0 - mL2)
    zh = diag2 * d2 + rri2 * d2_sw
    zh_sw = _swap_halves(zh, Dp)
    o_ref[...] = g2_ref[0] * zh + g2_ref[1] * zh_sw + g2_ref[2]


def patch_embed_fused(xpack, g1, w, b, g2, *, K, D, Dp, block_b):
    B, N, K2 = xpack.shape
    Dp2 = 2 * Dp
    kernel = functools.partial(_patch_embed_kernel, K=K, D=D, Dp=Dp)
    # VMEM budget (f32 unless noted): 2*(x_blk + o_blk) + 2*consts.  At the demo
    # shapes this is ~0.3 MiB.  When scaling C,H,W,D re-budget against 32 MiB
    # default scoped (16 MiB on v5e) / 64 MiB physical on v7x and pass
    # vmem_limit_bytes explicitly instead of shrinking block_b.
    return pl.pallas_call(
        kernel,
        grid=(B // block_b,),
        in_specs=[
            pl.BlockSpec((block_b, N, K2), lambda bi: (bi, 0, 0)),
            pl.BlockSpec((3, N, K2), lambda bi: (0, 0, 0)),
            pl.BlockSpec((K2, Dp2), lambda bi: (0, 0)),
            pl.BlockSpec((1, Dp2), lambda bi: (0, 0)),
            pl.BlockSpec((3, N, Dp2), lambda bi: (0, 0, 0)),
        ],
        out_specs=pl.BlockSpec((block_b, N, Dp2), lambda bi: (bi, 0, 0)),
        out_shape=jax.ShapeDtypeStruct((B, N, Dp2), jnp.float32),
        compiler_params=pltpu.CompilerParams(
            dimension_semantics=("parallel",)),
    )(xpack, g1, w, b, g2)


# ------------------------------ params / packing ---------------------------- #

def rope_embedding(Hp, Wp, D):
    """2D RoPE (Heo et al. 2024) as (real, imag) float32 planes, shape (D, Hp, Wp)."""
    fs = 100.0
    pos_h = jnp.arange(Hp, dtype=jnp.float32)
    pos_w = jnp.arange(Wp, dtype=jnp.float32)
    theta = fs ** (jnp.arange(0, D, 2, dtype=jnp.float32) / (D / 2.0))   # (D/2,)
    ang_h = theta[:, None] * pos_h[None, :]
    ang_w = theta[:, None] * pos_w[None, :]
    emb_re = jnp.zeros((D, Hp, Wp), jnp.float32)
    emb_im = jnp.zeros((D, Hp, Wp), jnp.float32)
    emb_re = emb_re.at[0::2].set(jnp.broadcast_to(jnp.cos(ang_h)[:, :, None], (D // 2, Hp, Wp)))
    emb_im = emb_im.at[0::2].set(jnp.broadcast_to(jnp.sin(ang_h)[:, :, None], (D // 2, Hp, Wp)))
    emb_re = emb_re.at[1::2].set(jnp.broadcast_to(jnp.cos(ang_w)[:, None, :], (D // 2, Hp, Wp)))
    emb_im = emb_im.at[1::2].set(jnp.broadcast_to(jnp.sin(ang_w)[:, None, :], (D // 2, Hp, Wp)))
    return emb_re, emb_im


def init_params(key, C, H, W, D, p, lane=128):
    Hp, Wp = H // p, W // p
    N, K = Hp * Wp, C * p * p
    Dp = ((D + lane - 1) // lane) * lane
    k1, k2, k3 = jax.random.split(key, 3)
    inv_sqrt2 = 1.0 / math.sqrt(2.0)

    # LN1 affine (normalized_shape = [C, H, W]) packed into the (N, 2K) layout.
    def pf(t):                                            # (C,H,W) -> (N, K)
        return _patchify(t[None], p)[0]
    grr1 = jnp.full((C, H, W), inv_sqrt2, jnp.float32)
    zch = jnp.zeros((C, H, W), jnp.float32)
    g1 = jnp.stack([
        jnp.concatenate([pf(grr1), pf(grr1)], axis=1),    # [grr | gii]
        jnp.concatenate([pf(zch), pf(zch)], axis=1),      # [gri | gri]
        jnp.concatenate([pf(zch), pf(zch)], axis=1),      # [beta_r | beta_i]
    ], axis=0)                                            # (3, N, 2K)

    # Complex Conv2d(C, D, kernel=stride=p) packed as ONE bf16 (2K, 2Dp) RHS.
    # Padded output columns MUST stay exactly zero (LN2 relies on it).
    w_re = 0.05 * jax.random.normal(k1, (D, C, p, p), jnp.float32)
    w_im = 0.05 * jax.random.normal(k2, (D, C, p, p), jnp.float32)
    b_re = 0.02 * jax.random.normal(k3, (D,), jnp.float32)
    b_im = jnp.zeros((D,), jnp.float32)
    wr = w_re.reshape(D, K).T                             # (K, D)
    wi = w_im.reshape(D, K).T
    padc = ((0, 0), (0, Dp - D))
    w_real_cols = jnp.pad(jnp.concatenate([wr, -wi], axis=0), padc)      # (2K, Dp)
    w_imag_cols = jnp.pad(jnp.concatenate([wi, wr], axis=0), padc)       # (2K, Dp)
    w_pack = jnp.concatenate([w_real_cols, w_imag_cols], axis=1).astype(jnp.bfloat16)
    b_pack = jnp.concatenate([jnp.pad(b_re, (0, Dp - D)),
                              jnp.pad(b_im, (0, Dp - D))]).reshape(1, 2 * Dp)

    # LN2 affine (normalized_shape = [D, Hp, Wp]) + constant RoPE folded into the
    # additive term, packed into the (N, 2Dp) layout with zero padding.
    pos_re, pos_im = rope_embedding(Hp, Wp, D)            # (D, Hp, Wp)

    def to_nd(t):                                         # (D,Hp,Wp) -> (N, Dp)
        return jnp.pad(t.transpose(1, 2, 0).reshape(N, D), ((0, 0), (0, Dp - D)))

    grr2 = to_nd(jnp.full((D, Hp, Wp), inv_sqrt2, jnp.float32))
    znd = jnp.zeros((N, Dp), jnp.float32)
    g2 = jnp.stack([
        jnp.concatenate([grr2, grr2], axis=1),            # [grr | gii]
        jnp.concatenate([znd, znd], axis=1),              # [gri | gri]
        jnp.concatenate([to_nd(pos_re), to_nd(pos_im)], axis=1),  # [b_r+rope_r | b_i+rope_i]
    ], axis=0)                                            # (3, N, 2Dp)

    return dict(
        patch_size=p, hidden_dim=D, Dp=Dp,
        g1=g1, w=w_pack, b=b_pack, g2=g2,
        raw=dict(w_re=w_re, w_im=w_im, b_re=b_re, b_im=b_im,
                 pos_re=pos_re, pos_im=pos_im),
    )


def patch_embedder_forward(x, params):
    """x: (B, C, H, W) complex64 -> (B, hidden_dim, H/p, W/p) complex64."""
    B, C, H, W = x.shape
    p, D, Dp = params["patch_size"], params["hidden_dim"], params["Dp"]
    Hp, Wp = H // p, W // p
    N, K = Hp * Wp, C * p * p

    # Prologue: real/imag split + patchify + lane-packing as one expression chain
    # (left to XLA to fuse into a single copy pass over the input).
    xs = jnp.stack([jnp.real(x), jnp.imag(x)], axis=1).astype(jnp.float32)  # (B,2,C,H,W)
    xs = xs.reshape(B, 2, C, Hp, p, Wp, p)
    xs = xs.transpose(0, 3, 5, 1, 2, 4, 6)                                  # (B,Hp,Wp,2,C,p,p)
    xpack = xs.reshape(B, N, 2 * K)                                         # [re | im] per row

    block_b = _choose_block_batch(B, N)
    out = patch_embed_fused(xpack, params["g1"], params["w"], params["b"],
                            params["g2"], K=K, D=D, Dp=Dp, block_b=block_b)  # (B, N, 2Dp)

    zr = out[:, :, :D]
    zi = out[:, :, Dp:Dp + D]
    z = lax.complex(zr, zi)
    return z.reshape(B, Hp, Wp, D).transpose(0, 3, 1, 2)                     # (B, D, Hp, Wp)


# --------------------------- pure-JAX reference check ------------------------ #

def _ln_ref(zr, zi, grr, gri, gii, br, bi):
    mu_r = zr.mean(axis=1, keepdims=True)
    mu_i = zi.mean(axis=1, keepdims=True)
    dr, di = zr - mu_r, zi - mu_i
    vrr = (dr * dr).mean(1, keepdims=True) + EPS
    vii = (di * di).mean(1, keepdims=True) + EPS
    vri = (dr * di).mean(1, keepdims=True)
    s = jnp.sqrt(vrr * vii - vri * vri)
    t = jnp.sqrt(vrr + vii + 2.0 * s)
    inv = 1.0 / (s * t)
    rrr, rii, rri = (vii + s) * inv, (vrr + s) * inv, -vri * inv
    xh_r = rrr * dr + rri * di
    xh_i = rri * dr + rii * di
    return grr * xh_r + gri * xh_i + br, gri * xh_r + gii * xh_i + bi


def _reference_forward(x, params):
    """Module semantics in plain JAX; the conv matmul is cast to bf16 (f32 acc) to
    match the kernel's MXU precision so the comparison stays tight."""
    B, C, H, W = x.shape
    p, D = params["patch_size"], params["hidden_dim"]
    Hp, Wp = H // p, W // p
    N, K = Hp * Wp, C * p * p
    raw = params["raw"]
    inv_sqrt2 = 1.0 / math.sqrt(2.0)
    bf = jnp.bfloat16

    xr = jnp.real(x).astype(jnp.float32).reshape(B, -1)
    xi = jnp.imag(x).astype(jnp.float32).reshape(B, -1)
    yr, yi = _ln_ref(xr, xi, inv_sqrt2, 0.0, inv_sqrt2, 0.0, 0.0)
    pr = _patchify(yr.reshape(B, C, H, W), p).reshape(B * N, K)
    pi = _patchify(yi.reshape(B, C, H, W), p).reshape(B * N, K)
    wr = raw["w_re"].reshape(D, K).T
    wi = raw["w_im"].reshape(D, K).T
    dot = lambda a, b: jnp.dot(a.astype(bf), b.astype(bf),
                               preferred_element_type=jnp.float32)
    cr = dot(pr, wr) - dot(pi, wi) + raw["b_re"]
    ci = dot(pr, wi) + dot(pi, wr) + raw["b_im"]
    cr = cr.reshape(B, Hp, Wp, D).transpose(0, 3, 1, 2).reshape(B, -1)
    ci = ci.reshape(B, Hp, Wp, D).transpose(0, 3, 1, 2).reshape(B, -1)
    zr, zi = _ln_ref(cr, ci, inv_sqrt2, 0.0, inv_sqrt2, 0.0, 0.0)
    zr = zr.reshape(B, D, Hp, Wp) + raw["pos_re"]
    zi = zi.reshape(B, D, Hp, Wp) + raw["pos_im"]
    return (zr + 1j * zi).astype(jnp.complex64)


if __name__ == "__main__":
    B, C, H, W = 2, 4, 16, 16
    D, p = 32, 4
    key = jax.random.PRNGKey(0)
    kxr, kxi, kp = jax.random.split(key, 3)
    x = (jax.random.normal(kxr, (B, C, H, W), jnp.float32)
         + 1j * jax.random.normal(kxi, (B, C, H, W), jnp.float32)).astype(jnp.complex64)
    params = init_params(kp, C, H, W, D, p)

    out = patch_embedder_forward(x, params)
    jax.block_until_ready(out)
    assert out.shape == (B, D, H // p, W // p), out.shape
    assert out.dtype == jnp.complex64, out.dtype

    ref = _reference_forward(x, params)
    err = float(jnp.max(jnp.abs(out - ref)))
    assert err == err and err < 5e-3, f"max abs error vs reference: {err}"
    print("KERNEL_OK")
</pallas_src>

<mosaic_0001>
module attributes {stable_mosaic.version = 11 : i64} {
  func.func @_patch_embed_kernel(%arg0: i32, %arg1: memref<1x16x128xf32, #tpu.memory_space<vmem>>, %arg2: memref<3x16x128xf32, #tpu.memory_space<vmem>>, %arg3: memref<128x256xbf16, #tpu.memory_space<vmem>>, %arg4: memref<1x256xf32, #tpu.memory_space<vmem>>, %arg5: memref<3x16x256xf32, #tpu.memory_space<vmem>>, %arg6: memref<1x16x256xf32, #tpu.memory_space<vmem>>) attributes {dimension_semantics = [#tpu.dimension_semantics<parallel>], iteration_bounds = array<i64: 2>, scalar_prefetch = 0 : i64, scratch_operands = 0 : i64, tpu.core_type = #tpu.core_type<tc>, window_params = [{transform_indices = @transform_0, window_bounds = array<i64: 1, 16, 128>}, {pipeline_mode = #tpu.pipeline_mode<synchronous>, transform_indices = @transform_1, window_bounds = array<i64: 3, 16, 128>}, {pipeline_mode = #tpu.pipeline_mode<synchronous>, transform_indices = @transform_2, window_bounds = array<i64: 128, 256>}, {pipeline_mode = #tpu.pipeline_mode<synchronous>, transform_indices = @transform_3, window_bounds = array<i64: 1, 256>}, {pipeline_mode = #tpu.pipeline_mode<synchronous>, transform_indices = @transform_4, window_bounds = array<i64: 3, 16, 256>}, {transform_indices = @transform_5, window_bounds = array<i64: 1, 16, 256>}]} {
    %c0 = arith.constant 0 : index
    %c0_0 = arith.constant 0 : index
    %c0_1 = arith.constant 0 : index
    %0 = vector.load %arg1[%c0, %c0_0, %c0_1] : memref<1x16x128xf32, #tpu.memory_space<vmem>>, vector<1x16x128xf32>
    %1 = tpu.iota {dimensions = array<i32: 1>} : vector<1x128xi32>
    %c64_i32 = arith.constant 64 : i32
    %2 = vector.broadcast %c64_i32 : i32 to vector<1x128xi32>
    %3 = arith.cmpi slt, %1, %2 : vector<1x128xi32>
    %4 = arith.extui %3 : vector<1x128xi1> to vector<1x128xi32>
    %5 = arith.sitofp %4 : vector<1x128xi32> to vector<1x128xf32>
    %6 = tpu.iota {dimensions = array<i32: 1>} : vector<1x256xi32>
    %c128_i32 = arith.constant 128 : i32
    %7 = vector.broadcast %c128_i32 : i32 to vector<1x256xi32>
    %8 = arith.cmpi slt, %6, %7 : vector<1x256xi32>
    %9 = arith.extui %8 : vector<1x256xi1> to vector<1x256xi32>
    %10 = arith.sitofp %9 : vector<1x256xi32> to vector<1x256xf32>
    %cst = arith.constant dense<0.000000e+00> : vector<1x16xf32>
    %11 = vector.multi_reduction <add>, %0, %cst [2] : vector<1x16x128xf32> to vector<1x16xf32>
    %12 = vector.shape_cast %11 : vector<1x16xf32> to vector<1x16x1xf32>
    %cst_2 = arith.constant dense<0.000000e+00> : vector<1x1xf32>
    %13 = vector.multi_reduction <add>, %12, %cst_2 [1] : vector<1x16x1xf32> to vector<1x1xf32>
    %14 = vector.shape_cast %13 : vector<1x1xf32> to vector<1x1x1xf32>
    %15 = vector.shape_cast %5 : vector<1x128xf32> to vector<1x1x128xf32>
    %16 = vector.broadcast %15 : vector<1x1x128xf32> to vector<1x16x128xf32>
    %17 = arith.mulf %0, %16 : vector<1x16x128xf32>
    %cst_3 = arith.constant dense<0.000000e+00> : vector<1x16xf32>
    %18 = vector.multi_reduction <add>, %17, %cst_3 [2] : vector<1x16x128xf32> to vector<1x16xf32>
    %19 = vector.shape_cast %18 : vector<1x16xf32> to vector<1x16x1xf32>
    %cst_4 = arith.constant dense<0.000000e+00> : vector<1x1xf32>
    %20 = vector.multi_reduction <add>, %19, %cst_4 [1] : vector<1x16x1xf32> to vector<1x1xf32>
    %21 = vector.shape_cast %20 : vector<1x1xf32> to vector<1x1x1xf32>
    %cst_5 = arith.constant 9.765625E-4 : f32
    %22 = vector.broadcast %cst_5 : f32 to vector<1x1x1xf32>
    %23 = arith.mulf %21, %22 : vector<1x1x1xf32>
    %24 = arith.subf %14, %21 : vector<1x1x1xf32>
    %cst_6 = arith.constant 9.765625E-4 : f32
    %25 = vector.broadcast %cst_6 : f32 to vector<1x1x1xf32>
    %26 = arith.mulf %24, %25 : vector<1x1x1xf32>
    %27 = vector.shape_cast %5 : vector<1x128xf32> to vector<1x1x128xf32>
    %28 = vector.broadcast %23 : vector<1x1x1xf32> to vector<1x1x128xf32>
    %29 = arith.mulf %28, %27 : vector<1x1x128xf32>
    %cst_7 = arith.constant 1.000000e+00 : f32
    %30 = vector.broadcast %cst_7 : f32 to vector<1x128xf32>
    %31 = arith.subf %30, %5 : vector<1x128xf32>
    %32 = vector.shape_cast %31 : vector<1x128xf32> to vector<1x1x128xf32>
    %33 = vector.broadcast %26 : vector<1x1x1xf32> to vector<1x1x128xf32>
    %34 = arith.mulf %33, %32 : vector<1x1x128xf32>
    %35 = arith.addf %29, %34 : vector<1x1x128xf32>
    %36 = vector.broadcast %35 : vector<1x1x128xf32> to vector<1x16x128xf32>
    %37 = arith.subf %0, %36 : vector<1x16x128xf32>
    %38 = vector.shape_cast %37 : vector<1x16x128xf32> to vector<16x128xf32>
    %c64_i32_8 = arith.constant 64 : i32
    %39 = tpu.dynamic_rotate %38 by %c64_i32_8 dim 1 : vector<16x128xf32>, i32 -> vector<16x128xf32>
    %40 = vector.shape_cast %39 : vector<16x128xf32> to vector<1x16x128xf32>
    %41 = arith.mulf %37, %37 : vector<1x16x128xf32>
    %cst_9 = arith.constant dense<0.000000e+00> : vector<1x16xf32>
    %42 = vector.multi_reduction <add>, %41, %cst_9 [2] : vector<1x16x128xf32> to vector<1x16xf32>
    %43 = vector.shape_cast %42 : vector<1x16xf32> to vector<1x16x1xf32>
    %cst_10 = arith.constant dense<0.000000e+00> : vector<1x1xf32>
    %44 = vector.multi_reduction <add>, %43, %cst_10 [1] : vector<1x16x1xf32> to vector<1x1xf32>
    %45 = vector.shape_cast %44 : vector<1x1xf32> to vector<1x1x1xf32>
    %46 = vector.shape_cast %5 : vector<1x128xf32> to vector<1x1x128xf32>
    %47 = vector.broadcast %46 : vector<1x1x128xf32> to vector<1x16x128xf32>
    %48 = arith.mulf %41, %47 : vector<1x16x128xf32>
    %cst_11 = arith.constant dense<0.000000e+00> : vector<1x16xf32>
    %49 = vector.multi_reduction <add>, %48, %cst_11 [2] : vector<1x16x128xf32> to vector<1x16xf32>
    %50 = vector.shape_cast %49 : vector<1x16xf32> to vector<1x16x1xf32>
    %cst_12 = arith.constant dense<0.000000e+00> : vector<1x1xf32>
    %51 = vector.multi_reduction <add>, %50, %cst_12 [1] : vector<1x16x1xf32> to vector<1x1xf32>
    %52 = vector.shape_cast %51 : vector<1x1xf32> to vector<1x1x1xf32>
    %cst_13 = arith.constant 9.765625E-4 : f32
    %53 = vector.broadcast %cst_13 : f32 to vector<1x1x1xf32>
    %54 = arith.mulf %52, %53 : vector<1x1x1xf32>
    %cst_14 = arith.constant 9.99999974E-6 : f32
    %55 = vector.broadcast %cst_14 : f32 to vector<1x1x1xf32>
    %56 = arith.addf %54, %55 : vector<1x1x1xf32>
    %57 = arith.subf %45, %52 : vector<1x1x1xf32>
    %cst_15 = arith.constant 9.765625E-4 : f32
    %58 = vector.broadcast %cst_15 : f32 to vector<1x1x1xf32>
    %59 = arith.mulf %57, %58 : vector<1x1x1xf32>
    %cst_16 = arith.constant 9.99999974E-6 : f32
    %60 = vector.broadcast %cst_16 : f32 to vector<1x1x1xf32>
    %61 = arith.addf %59, %60 : vector<1x1x1xf32>
    %62 = arith.mulf %37, %40 : vector<1x16x128xf32>
    %cst_17 = arith.constant dense<0.000000e+00> : vector<1x16xf32>
    %63 = vector.multi_reduction <add>, %62, %cst_17 [2] : vector<1x16x128xf32> to vector<1x16xf32>
    %64 = vector.shape_cast %63 : vector<1x16xf32> to vector<1x16x1xf32>
    %cst_18 = arith.constant dense<0.000000e+00> : vector<1x1xf32>
    %65 = vector.multi_reduction <add>, %64, %cst_18 [1] : vector<1x16x1xf32> to vector<1x1xf32>
    %66 = vector.shape_cast %65 : vector<1x1xf32> to vector<1x1x1xf32>
    %cst_19 = arith.constant 5.000000e-01 : f32
    %67 = vector.broadcast %cst_19 : f32 to vector<1x1x1xf32>
    %68 = arith.mulf %67, %66 : vector<1x1x1xf32>
    %cst_20 = arith.constant 9.765625E-4 : f32
    %69 = vector.broadcast %cst_20 : f32 to vector<1x1x1xf32>
    %70 = arith.mulf %68, %69 : vector<1x1x1xf32>
    %71 = arith.mulf %56, %61 : vector<1x1x1xf32>
    %72 = arith.mulf %70, %70 : vector<1x1x1xf32>
    %73 = arith.subf %71, %72 : vector<1x1x1xf32>
    %74 = math.sqrt %73 : vector<1x1x1xf32>
    %75 = arith.addf %56, %61 : vector<1x1x1xf32>
    %cst_21 = arith.constant 2.000000e+00 : f32
    %76 = vector.broadcast %cst_21 : f32 to vector<1x1x1xf32>
    %77 = arith.mulf %76, %74 : vector<1x1x1xf32>
    %78 = arith.addf %75, %77 : vector<1x1x1xf32>
    %79 = arith.mulf %73, %78 : vector<1x1x1xf32>
    %80 = math.rsqrt %79 : vector<1x1x1xf32>
    %81 = arith.addf %61, %74 : vector<1x1x1xf32>
    %82 = arith.mulf %81, %80 : vector<1x1x1xf32>
    %83 = arith.addf %56, %74 : vector<1x1x1xf32>
    %84 = arith.mulf %83, %80 : vector<1x1x1xf32>
    %cst_22 = arith.constant 0.000000e+00 : f32
    %85 = vector.broadcast %cst_22 : f32 to vector<1x1x1xf32>
    %86 = arith.subf %85, %70 : vector<1x1x1xf32>
    %87 = arith.mulf %86, %80 : vector<1x1x1xf32>
    %88 = vector.shape_cast %5 : vector<1x128xf32> to vector<1x1x128xf32>
    %89 = vector.broadcast %82 : vector<1x1x1xf32> to vector<1x1x128xf32>
    %90 = arith.mulf %89, %88 : vector<1x1x128xf32>
    %cst_23 = arith.constant 1.000000e+00 : f32
    %91 = vector.broadcast %cst_23 : f32 to vector<1x128xf32>
    %92 = arith.subf %91, %5 : vector<1x128xf32>
    %93 = vector.shape_cast %92 : vector<1x128xf32> to vector<1x1x128xf32>
    %94 = vector.broadcast %84 : vector<1x1x1xf32> to vector<1x1x128xf32>
    %95 = arith.mulf %94, %93 : vector<1x1x128xf32>
    %96 = arith.addf %90, %95 : vector<1x1x128xf32>
    %97 = vector.broadcast %96 : vector<1x1x128xf32> to vector<1x16x128xf32>
    %98 = arith.mulf %97, %37 : vector<1x16x128xf32>
    %99 = vector.broadcast %87 : vector<1x1x1xf32> to vector<1x16x128xf32>
    %100 = arith.mulf %99, %40 : vector<1x16x128xf32>
    %101 = arith.addf %98, %100 : vector<1x16x128xf32>
    %102 = vector.shape_cast %101 : vector<1x16x128xf32> to vector<16x128xf32>
    %c64_i32_24 = arith.constant 64 : i32
    %103 = tpu.dynamic_rotate %102 by %c64_i32_24 dim 1 : vector<16x128xf32>, i32 -> vector<16x128xf32>
    %104 = vector.shape_cast %103 : vector<16x128xf32> to vector<1x16x128xf32>
    %c0_25 = arith.constant 0 : index
    %c0_26 = arith.constant 0 : index
    %c0_27 = arith.constant 0 : index
    %105 = vector.load %arg2[%c0_25, %c0_26, %c0_27] : memref<3x16x128xf32, #tpu.memory_space<vmem>>, vector<1x16x128xf32>
    %106 = vector.shape_cast %105 : vector<1x16x128xf32> to vector<16x128xf32>
    %107 = vector.shape_cast %106 : vector<16x128xf32> to vector<1x16x128xf32>
    %108 = arith.mulf %107, %101 : vector<1x16x128xf32>
    %c1 = arith.constant 1 : index
    %c0_28 = arith.constant 0 : index
    %c0_29 = arith.constant 0 : index
    %109 = vector.load %arg2[%c1, %c0_28, %c0_29] : memref<3x16x128xf32, #tpu.memory_space<vmem>>, vector<1x16x128xf32>
    %110 = vector.shape_cast %109 : vector<1x16x128xf32> to vector<16x128xf32>
    %111 = vector.shape_cast %110 : vector<16x128xf32> to vector<1x16x128xf32>
    %112 = arith.mulf %111, %104 : vector<1x16x128xf32>
    %113 = arith.addf %108, %112 : vector<1x16x128xf32>
    %c2 = arith.constant 2 : index
    %c0_30 = arith.constant 0 : index
    %c0_31 = arith.constant 0 : index
    %114 = vector.load %arg2[%c2, %c0_30, %c0_31] : memref<3x16x128xf32, #tpu.memory_space<vmem>>, vector<1x16x128xf32>
    %115 = vector.shape_cast %114 : vector<1x16x128xf32> to vector<16x128xf32>
    %116 = vector.shape_cast %115 : vector<16x128xf32> to vector<1x16x128xf32>
    %117 = arith.addf %113, %116 : vector<1x16x128xf32>
    %118 = vector.shape_cast %117 : vector<1x16x128xf32> to vector<16x128xf32>
    %119 = arith.truncf %118 : vector<16x128xf32> to vector<16x128xbf16>
    %c0_32 = arith.constant 0 : index
    %c0_33 = arith.constant 0 : index
    %120 = vector.load %arg3[%c0_32, %c0_33] : memref<128x256xbf16, #tpu.memory_space<vmem>>, vector<128x256xbf16>
    %cst_34 = arith.constant dense<0.000000e+00> : vector<16x256xf32>
    %121 = tpu.matmul %119, %120, %cst_34 {dimension_numbers = #tpu.dot_dimension_numbers<[1], [0], [0], [1], [0, 0, 1, 1], [], []>} : vector<16x128xbf16>, vector<128x256xbf16>, vector<16x256xf32> -> vector<16x256xf32>
    %122 = vector.shape_cast %121 : vector<16x256xf32> to vector<1x16x256xf32>
    %c0_35 = arith.constant 0 : index
    %c0_36 = arith.constant 0 : index
    %123 = vector.load %arg4[%c0_35, %c0_36] : memref<1x256xf32, #tpu.memory_space<vmem>>, vector<1x256xf32>
    %124 = vector.shape_cast %123 : vector<1x256xf32> to vector<1x1x256xf32>
    %125 = vector.broadcast %124 : vector<1x1x256xf32> to vector<1x16x256xf32>
    %126 = arith.addf %122, %125 : vector<1x16x256xf32>
    %cst_37 = arith.constant dense<0.000000e+00> : vector<1x16xf32>
    %127 = vector.multi_reduction <add>, %126, %cst_37 [2] : vector<1x16x256xf32> to vector<1x16xf32>
    %128 = vector.shape_cast %127 : vector<1x16xf32> to vector<1x16x1xf32>
    %cst_38 = arith.constant dense<0.000000e+00> : vector<1x1xf32>
    %129 = vector.multi_reduction <add>, %128, %cst_38 [1] : vector<1x16x1xf32> to vector<1x1xf32>
    %130 = vector.shape_cast %129 : vector<1x1xf32> to vector<1x1x1xf32>
    %131 = vector.shape_cast %10 : vector<1x256xf32> to vector<1x1x256xf32>
    %132 = vector.broadcast %131 : vector<1x1x256xf32> to vector<1x16x256xf32>
    %133 = arith.mulf %126, %132 : vector<1x16x256xf32>
    %cst_39 = arith.constant dense<0.000000e+00> : vector<1x16xf32>
    %134 = vector.multi_reduction <add>, %133, %cst_39 [2] : vector<1x16x256xf32> to vector<1x16xf32>
    %135 = vector.shape_cast %134 : vector<1x16xf32> to vector<1x16x1xf32>
    %cst_40 = arith.constant dense<0.000000e+00> : vector<1x1xf32>
    %136 = vector.multi_reduction <add>, %135, %cst_40 [1] : vector<1x16x1xf32> to vector<1x1xf32>
    %137 = vector.shape_cast %136 : vector<1x1xf32> to vector<1x1x1xf32>
    %cst_41 = arith.constant 0.001953125 : f32
    %138 = vector.broadcast %cst_41 : f32 to vector<1x1x1xf32>
    %139 = arith.mulf %137, %138 : vector<1x1x1xf32>
    %140 = arith.subf %130, %137 : vector<1x1x1xf32>
    %cst_42 = arith.constant 0.001953125 : f32
    %141 = vector.broadcast %cst_42 : f32 to vector<1x1x1xf32>
    %142 = arith.mulf %140, %141 : vector<1x1x1xf32>
    %143 = vector.shape_cast %10 : vector<1x256xf32> to vector<1x1x256xf32>
    %144 = vector.broadcast %139 : vector<1x1x1xf32> to vector<1x1x256xf32>
    %145 = arith.mulf %144, %143 : vector<1x1x256xf32>
    %cst_43 = arith.constant 1.000000e+00 : f32
    %146 = vector.broadcast %cst_43 : f32 to vector<1x256xf32>
    %147 = arith.subf %146, %10 : vector<1x256xf32>
    %148 = vector.shape_cast %147 : vector<1x256xf32> to vector<1x1x256xf32>
    %149 = vector.broadcast %142 : vector<1x1x1xf32> to vector<1x1x256xf32>
    %150 = arith.mulf %149, %148 : vector<1x1x256xf32>
    %151 = arith.addf %145, %150 : vector<1x1x256xf32>
    %152 = vector.broadcast %151 : vector<1x1x256xf32> to vector<1x16x256xf32>
    %153 = arith.subf %126, %152 : vector<1x16x256xf32>
    %c128_i32_44 = arith.constant 128 : i32
    %c0_i32 = arith.constant 0 : i32
    %154 = arith.cmpi eq, %c128_i32_44, %c0_i32 : i32
    %c1_i32 = arith.constant 1 : i32
    %155 = arith.select %154, %c1_i32, %c128_i32_44 : i32
    %156 = vector.broadcast %155 : i32 to vector<1x256xi32>
    %157 = arith.remsi %6, %156 : vector<1x256xi32>
    %c0_i32_45 = arith.constant 0 : i32
    %158 = vector.broadcast %c0_i32_45 : i32 to vector<1x256xi32>
    %159 = arith.cmpi ne, %157, %158 : vector<1x256xi32>
    %c0_i32_46 = arith.constant 0 : i32
    %160 = vector.broadcast %c0_i32_46 : i32 to vector<1x256xi32>
    %161 = arith.cmpi slt, %157, %160 : vector<1x256xi32>
    %c0_i32_47 = arith.constant 0 : i32
    %162 = arith.cmpi slt, %155, %c0_i32_47 : i32
    %163 = vector.broadcast %162 : i1 to vector<1x256xi1>
    %164 = vector.broadcast %163 : vector<1x256xi1> to vector<1x256xi1>
    %165 = arith.xori %161, %164 : vector<1x256xi1>
    %166 = arith.andi %165, %159 : vector<1x256xi1>
    %167 = vector.broadcast %155 : i32 to vector<1x256xi32>
    %168 = arith.addi %157, %167 : vector<1x256xi32>
    %169 = arith.select %166, %168, %157 : vector<1x256xi1>, vector<1x256xi32>
    %c32_i32 = arith.constant 32 : i32
    %170 = vector.broadcast %c32_i32 : i32 to vector<1x256xi32>
    %171 = arith.cmpi slt, %169, %170 : vector<1x256xi32>
    %172 = arith.extui %171 : vector<1x256xi1> to vector<1x256xi32>
    %173 = arith.sitofp %172 : vector<1x256xi32> to vector<1x256xf32>
    %174 = vector.shape_cast %173 : vector<1x256xf32> to vector<1x1x256xf32>
    %175 = vector.broadcast %174 : vector<1x1x256xf32> to vector<1x16x256xf32>
    %176 = arith.mulf %153, %175 : vector<1x16x256xf32>
    %177 = vector.shape_cast %176 : vector<1x16x256xf32> to vector<16x256xf32>
    %c128_i32_48 = arith.constant 128 : i32
    %178 = tpu.dynamic_rotate %177 by %c128_i32_48 dim 1 : vector<16x256xf32>, i32 -> vector<16x256xf32>
    %179 = vector.shape_cast %178 : vector<16x256xf32> to vector<1x16x256xf32>
    %180 = arith.mulf %176, %176 : vector<1x16x256xf32>
    %cst_49 = arith.constant dense<0.000000e+00> : vector<1x16xf32>
    %181 = vector.multi_reduction <add>, %180, %cst_49 [2] : vector<1x16x256xf32> to vector<1x16xf32>
    %182 = vector.shape_cast %181 : vector<1x16xf32> to vector<1x16x1xf32>
    %cst_50 = arith.constant dense<0.000000e+00> : vector<1x1xf32>
    %183 = vector.multi_reduction <add>, %182, %cst_50 [1] : vector<1x16x1xf32> to vector<1x1xf32>
    %184 = vector.shape_cast %183 : vector<1x1xf32> to vector<1x1x1xf32>
    %185 = vector.shape_cast %10 : vector<1x256xf32> to vector<1x1x256xf32>
    %186 = vector.broadcast %185 : vector<1x1x256xf32> to vector<1x16x256xf32>
    %187 = arith.mulf %180, %186 : vector<1x16x256xf32>
    %cst_51 = arith.constant dense<0.000000e+00> : vector<1x16xf32>
    %188 = vector.multi_reduction <add>, %187, %cst_51 [2] : vector<1x16x256xf32> to vector<1x16xf32>
    %189 = vector.shape_cast %188 : vector<1x16xf32> to vector<1x16x1xf32>
    %cst_52 = arith.constant dense<0.000000e+00> : vector<1x1xf32>
    %190 = vector.multi_reduction <add>, %189, %cst_52 [1] : vector<1x16x1xf32> to vector<1x1xf32>
    %191 = vector.shape_cast %190 : vector<1x1xf32> to vector<1x1x1xf32>
    %cst_53 = arith.constant 0.001953125 : f32
    %192 = vector.broadcast %cst_53 : f32 to vector<1x1x1xf32>
    %193 = arith.mulf %191, %192 : vector<1x1x1xf32>
    %cst_54 = arith.constant 9.99999974E-6 : f32
    %194 = vector.broadcast %cst_54 : f32 to vector<1x1x1xf32>
    %195 = arith.addf %193, %194 : vector<1x1x1xf32>
    %196 = arith.subf %184, %191 : vector<1x1x1xf32>
    %cst_55 = arith.constant 0.001953125 : f32
    %197 = vector.broadcast %cst_55 : f32 to vector<1x1x1xf32>
    %198 = arith.mulf %196, %197 : vector<1x1x1xf32>
    %cst_56 = arith.constant 9.99999974E-6 : f32
    %199 = vector.broadcast %cst_56 : f32 to vector<1x1x1xf32>
    %200 = arith.addf %198, %199 : vector<1x1x1xf32>
    %201 = arith.mulf %176, %179 : vector<1x16x256xf32>
    %cst_57 = arith.constant dense<0.000000e+00> : vector<1x16xf32>
    %202 = vector.multi_reduction <add>, %201, %cst_57 [2] : vector<1x16x256xf32> to vector<1x16xf32>
    %203 = vector.shape_cast %202 : vector<1x16xf32> to vector<1x16x1xf32>
    %cst_58 = arith.constant dense<0.000000e+00> : vector<1x1xf32>
    %204 = vector.multi_reduction <add>, %203, %cst_58 [1] : vector<1x16x1xf32> to vector<1x1xf32>
    %205 = vector.shape_cast %204 : vector<1x1xf32> to vector<1x1x1xf32>
    %cst_59 = arith.constant 5.000000e-01 : f32
    %206 = vector.broadcast %cst_59 : f32 to vector<1x1x1xf32>
    %207 = arith.mulf %206, %205 : vector<1x1x1xf32>
    %cst_60 = arith.constant 0.001953125 : f32
    %208 = vector.broadcast %cst_60 : f32 to vector<1x1x1xf32>
    %209 = arith.mulf %207, %208 : vector<1x1x1xf32>
    %210 = arith.mulf %195, %200 : vector<1x1x1xf32>
    %211 = arith.mulf %209, %209 : vector<1x1x1xf32>
    %212 = arith.subf %210, %211 : vector<1x1x1xf32>
    %213 = math.sqrt %212 : vector<1x1x1xf32>
    %214 = arith.addf %195, %200 : vector<1x1x1xf32>
    %cst_61 = arith.constant 2.000000e+00 : f32
    %215 = vector.broadcast %cst_61 : f32 to vector<1x1x1xf32>
    %216 = arith.mulf %215, %213 : vector<1x1x1xf32>
    %217 = arith.addf %214, %216 : vector<1x1x1xf32>
    %218 = arith.mulf %212, %217 : vector<1x1x1xf32>
    %219 = math.rsqrt %218 : vector<1x1x1xf32>
    %220 = arith.addf %200, %213 : vector<1x1x1xf32>
    %221 = arith.mulf %220, %219 : vector<1x1x1xf32>
    %222 = arith.addf %195, %213 : vector<1x1x1xf32>
    %223 = arith.mulf %222, %219 : vector<1x1x1xf32>
    %cst_62 = arith.constant 0.000000e+00 : f32
    %224 = vector.broadcast %cst_62 : f32 to vector<1x1x1xf32>
    %225 = arith.subf %224, %209 : vector<1x1x1xf32>
    %226 = arith.mulf %225, %219 : vector<1x1x1xf32>
    %227 = vector.shape_cast %10 : vector<1x256xf32> to vector<1x1x256xf32>
    %228 = vector.broadcast %221 : vector<1x1x1xf32> to vector<1x1x256xf32>
    %229 = arith.mulf %228, %227 : vector<1x1x256xf32>
    %cst_63 = arith.constant 1.000000e+00 : f32
    %230 = vector.broadcast %cst_63 : f32 to vector<1x256xf32>
    %231 = arith.subf %230, %10 : vector<1x256xf32>
    %232 = vector.shape_cast %231 : vector<1x256xf32> to vector<1x1x256xf32>
    %233 = vector.broadcast %223 : vector<1x1x1xf32> to vector<1x1x256xf32>
    %234 = arith.mulf %233, %232 : vector<1x1x256xf32>
    %235 = arith.addf %229, %234 : vector<1x1x256xf32>
    %236 = vector.broadcast %235 : vector<1x1x256xf32> to vector<1x16x256xf32>
    %237 = arith.mulf %236, %176 : vector<1x16x256xf32>
    %238 = vector.broadcast %226 : vector<1x1x1xf32> to vector<1x16x256xf32>
    %239 = arith.mulf %238, %179 : vector<1x16x256xf32>
    %240 = arith.addf %237, %239 : vector<1x16x256xf32>
    %241 = vector.shape_cast %240 : vector<1x16x256xf32> to vector<16x256xf32>
    %c128_i32_64 = arith.constant 128 : i32
    %242 = tpu.dynamic_rotate %241 by %c128_i32_64 dim 1 : vector<16x256xf32>, i32 -> vector<16x256xf32>
    %243 = vector.shape_cast %242 : vector<16x256xf32> to vector<1x16x256xf32>
    %c0_65 = arith.constant 0 : index
    %c0_66 = arith.constant 0 : index
    %c0_67 = arith.constant 0 : index
    %244 = vector.load %arg5[%c0_65, %c0_66, %c0_67] : memref<3x16x256xf32, #tpu.memory_space<vmem>>, vector<1x16x256xf32>
    %245 = vector.shape_cast %244 : vector<1x16x256xf32> to vector<16x256xf32>
    %246 = vector.shape_cast %245 : vector<16x256xf32> to vector<1x16x256xf32>
    %247 = arith.mulf %246, %240 : vector<1x16x256xf32>
    %c1_68 = arith.constant 1 : index
    %c0_69 = arith.constant 0 : index
    %c0_70 = arith.constant 0 : index
    %248 = vector.load %arg5[%c1_68, %c0_69, %c0_70] : memref<3x16x256xf32, #tpu.memory_space<vmem>>, vector<1x16x256xf32>
    %249 = vector.shape_cast %248 : vector<1x16x256xf32> to vector<16x256xf32>
    %250 = vector.shape_cast %249 : vector<16x256xf32> to vector<1x16x256xf32>
    %251 = arith.mulf %250, %243 : vector<1x16x256xf32>
    %252 = arith.addf %247, %251 : vector<1x16x256xf32>
    %c2_71 = arith.constant 2 : index
    %c0_72 = arith.constant 0 : index
    %c0_73 = arith.constant 0 : index
    %253 = vector.load %arg5[%c2_71, %c0_72, %c0_73] : memref<3x16x256xf32, #tpu.memory_space<vmem>>, vector<1x16x256xf32>
    %254 = vector.shape_cast %253 : vector<1x16x256xf32> to vector<16x256xf32>
    %255 = vector.shape_cast %254 : vector<16x256xf32> to vector<1x16x256xf32>
    %256 = arith.addf %252, %255 : vector<1x16x256xf32>
    %c0_74 = arith.constant 0 : index
    %c0_75 = arith.constant 0 : index
    %c0_76 = arith.constant 0 : index
    %257 = vector.load %arg6[%c0_74, %c0_75, %c0_76] : memref<1x16x256xf32, #tpu.memory_space<vmem>>, vector<1x16x256xf32>
    tpu.vector_store %arg6[%c0_74, %c0_75, %c0_76], %256 {strides = array<i32>} : memref<1x16x256xf32, #tpu.memory_space<vmem>>, vector<1x16x256xf32>,
    return
  }
  func.func @transform_0(%arg0: i32) -> (i32, i32, i32) {
    %c0_i32 = arith.constant 0 : i32
    %c0_i32_0 = arith.constant 0 : i32
    %c0_i32_1 = arith.constant 0 : i32
    return %arg0, %c0_i32, %c0_i32_0 : i32, i32, i32
  }
  func.func @transform_1(%arg0: i32) -> (i32, i32, i32) {
    %c0_i32 = arith.constant 0 : i32
    %c0_i32_0 = arith.constant 0 : i32
    %c0_i32_1 = arith.constant 0 : i32
    %c0_i32_2 = arith.constant 0 : i32
    return %c0_i32, %c0_i32_0, %c0_i32_1 : i32, i32, i32
  }
  func.func @transform_2(%arg0: i32) -> (i32, i32) {
    %c0_i32 = arith.constant 0 : i32
    %c0_i32_0 = arith.constant 0 : i32
    %c0_i32_1 = arith.constant 0 : i32
    return %c0_i32, %c0_i32_0 : i32, i32
  }
  func.func @transform_3(%arg0: i32) -> (i32, i32) {
    %c0_i32 = arith.constant 0 : i32
    %c0_i32_0 = arith.constant 0 : i32
    %c0_i32_1 = arith.constant 0 : i32
    return %c0_i32, %c0_i32_0 : i32, i32
  }
  func.func @transform_4(%arg0: i32) -> (i32, i32, i32) {
    %c0_i32 = arith.constant 0 : i32
    %c0_i32_0 = arith.constant 0 : i32
    %c0_i32_1 = arith.constant 0 : i32
    %c0_i32_2 = arith.constant 0 : i32
    return %c0_i32, %c0_i32_0, %c0_i32_1 : i32, i32, i32
  }
  func.func @transform_5(%arg0: i32) -> (i32, i32, i32) {
    %c0_i32 = arith.constant 0 : i32
    %c0_i32_0 = arith.constant 0 : i32
    %c0_i32_1 = arith.constant 0 : i32
    return %arg0, %c0_i32, %c0_i32_0 : i32, i32, i32
  }
}

</mosaic_0001>

<bundles_post_ra>
// kernel: tpu_custom_call.1
= control target key start
LH: loop header
LB: loop body
LE: loop exit
PB: predicated region body
PF: predicated region fallthrough
CT: control target
= control target key end

     0   :  { %10 = vsyncpa [#allocation3], 0  ;;  %s1588_s0 = inlined_call_operand.hbm [shape: f32[2,16,128], index: 0, kind: input, shape index: {}]   ;;  %s1589_s1 = inlined_call_operand.hbm [shape: f32[3,16,128], index: 1, kind: input, shape index: {}]   ;;  %s1590_s2 = inlined_call_operand.hbm [shape: bf16[128,256], index: 2, kind: input, shape index: {}]   ;;  %s1591_s3 = inlined_call_operand.vmem [shape: f32[1,256], index: 3, kind: input, shape index: {}]   ;;  %s1592_s4 = inlined_call_operand.hbm [shape: f32[3,16,256], index: 4, kind: input, shape index: {}]   ;;  %s1593_s5 = inlined_call_operand.hbm [shape: f32[2,16,256], index: 5, kind: output, shape index: {}]  }
   0x1   :  { %12 = vsyncpa [#allocation3 + $0x1], 0 }
   0x2   :  { %13 = vsyncpa [#allocation6], 0 }
   0x3   :  { %14 = vsyncpa [#allocation9], 0 }
   0x4   :  { %15 = vsyncpa [#allocation4], 0 }
   0x5   :  { %17 = vsyncpa [#allocation4 + $0x1], 0  ;;  %s1298_s18 = smov 0   ;;  %s1300_s19 = smov 0  }
   0x6   :  { %s1302_s20 = smov 0   ;;  %s1304_s21 = smov 0  }
   0x7 LB: > { %s1319_s22 = sadd.s32 4294967295, %s1252_s21   ;;  %s915_s23 = sadd.s32 4294967294, %s1252_s21   ;;  %s1252_s21 = sphi %s1304_s21, %s1618_s21   ;;  %s1248_s20 = sphi %s1302_s20, %s1617_s20   ;;  %s1244_s19 = sphi %s1300_s19, %s1616_s19   ;;  %s1240_s18 = sphi %s1298_s18, %s1615_s18  }
   0x8   : > { %p43_p0 = scmp.ne.s32.totalorder %s1244_s19, %s1240_s18  ;;  %p1594_p1 = scmp.eq.s32.totalorder %s1319_s22, 0 }
   0x9   : > { %p151_p2 = scmp.eq.s32.totalorder %s1319_s22, 1  ;;  %p157_p3 = scmp.eq.s32.totalorder %s915_s23, 1 }
   0xa   : > { %p1328_p4 = por %p1594_p1, %p43_p0  ;;  %p916_p5 = scmp.ge.s32.totalorder %s1252_s21, 1 }
   0xb   : > { %p1333_p6 = por %p157_p3, %p43_p0  ;;  %p164_p7 = scmp.lt.s32.totalorder %s1252_s21, 3 }
   0xc   : > { %s1599_s24 = scalar_select %p1328_p4, 1, 0 }
   0xd   : > { %s1600_s25 = scalar_select %p1333_p6, 1, 0 }
   0xe   : > { %p1338_p8 = pnand %p916_p5, %p164_p7  ;;  %s1254_s27 = smov [#allocation5]  }
   0xf   : > { %s176_s28 = sshll.u32 %s1254_s27, 4  ;;  %s1255_s30 = smov [#allocation7]   ;;  %s177_s28 = int_to_ptr.vmem [resolvable:$true] %s176_s28 }
  0x10   : > { %s1601_s26 = scalar_select %p1338_p8, 1, 0 }
  0x11   : > { %p972_p9 = pneg %p1338_p8  ;;  %s189_s6 = sshll.u32 %s1255_s30, 4  ;;  %s190_s6 = int_to_ptr.vmem [resolvable:$true] %s189_s6 }
  0x12   : > { %s1256_s7 = smov [#allocation8]   ;;  %s1085_s9 = scalar_lea.vmem %s177_s28, 768 }
  0x13   : > { %p1347_p11 = pnand %p972_p9, %p1594_p1  ;;  %s205_s8 = sshll.u32 %s1256_s7, 4  ;;  %s206_s8 = int_to_ptr.vmem [resolvable:$true] %s205_s8 }
  0x14   : > { %p1086_p13 = scmp.ne.s32.totalorder %s177_s28, %s1085_s9  ;;  %p1093_p5 = scmp.lt.s32.totalorder %s177_s28, %s177_s28 }
  0x15   : > { %p1076_p12 = pneg %p1347_p11  ;;  %p1094_p7 = scmp.lt.s32.totalorder %s1085_s9, %s1085_s9 }
  0x17   : > { %p1088_p0 = pnand %p1086_p13, %p1076_p12  ;;  %p1095_p9 = por %p1094_p7, %p1093_p5 }
  0x19   : > { %p1089_p3 = pneg %p1088_p0 }
  0x1b   : > { %p1096_p10 = pnand %p1095_p9, %p1089_p3 }
  0x1d   : > { %1099 = shalt.err (!%p1096_p10)
}
  0x1e   : > { %s1595_s10 = smov 128   ;;  %s1258_s11 = smov 8  }
  0x1f   : > { %975 = dma.hbm_to_vmem [thread:$0]  (!%p1347_p11), %s1589_s1, 768, %s177_s28, [#allocation6], %s1595_s10, %s1595_s10, %s1258_s11  }
  0x20   : > { %s1111_s14 = scalar_lea.vmem %s190_s6, 2048  ;;  %p1119_p3 = scmp.lt.s32.totalorder %s190_s6, %s190_s6 }
  0x21   : > { %p1112_p13 = scmp.ne.s32.totalorder %s190_s6, %s1111_s14  ;;  %p1120_p10 = scmp.lt.s32.totalorder %s1111_s14, %s1111_s14 }
  0x23   : > { %p1114_p0 = pnand %p1112_p13, %p1076_p12  ;;  %p1121_p7 = por %p1120_p10, %p1119_p3 }
  0x25   : > { %p1115_p5 = pneg %p1114_p0 }
  0x27   : > { %p1122_p9 = pnand %p1121_p7, %p1115_p5 }
  0x29   : > { %1125 = shalt.err (!%p1122_p9)
}
  0x2a   : > { %978 = dma.hbm_to_vmem [thread:$0]  (!%p1347_p11), %s1590_s2, 2048, %s190_s6, [#allocation6], %s1595_s10, %s1595_s10, %s1258_s11  }
  0x2b   : > { %s1137_s17 = scalar_lea.vmem %s206_s8, 1536  ;;  %p1145_p3 = scmp.lt.s32.totalorder %s206_s8, %s206_s8 }
  0x2c   : > { %p1138_p1 = scmp.ne.s32.totalorder %s206_s8, %s1137_s17  ;;  %p1146_p5 = scmp.lt.s32.totalorder %s1137_s17, %s1137_s17 }
  0x2e   : > { %p1140_p13 = pnand %p1138_p1, %p1076_p12  ;;  %p1147_p10 = por %p1146_p5, %p1145_p3 }
  0x30   : > { %p1141_p0 = pneg %p1140_p13 }
  0x32   : > { %p1148_p7 = pnand %p1147_p10, %p1141_p0 }
  0x34   : > { %1151 = shalt.err (!%p1148_p7)
}
  0x35   : > { %s1259_s23 = smov 256   ;;  %s1260_s27 = smov 16  }
  0x36   : > { %981 = dma.hbm_to_vmem [thread:$0]  (!%p1347_p11), %s1592_s4, 1536, %s206_s8, [#allocation9], %s1259_s23, %s1259_s23, %s1260_s27  }
  0x37   : > { %s1384_s6 = sadd.s32 1, %s1252_s21   ;;  %s30_s9 = sadd.s32 1, %s1248_s20 }
  0x38   : > { %s27_s7 = ssub.s32 %s1252_s21, %s1384_s6  ;;  %p37_p12 = scmp.ne.s32.totalorder %s1248_s20, %s1244_s19 }
  0x39   : > { %p28_p1 = scmp.eq.s32.totalorder %s27_s7, 0  ;;  %p38_p9 = scmp.eq.s32.totalorder %s1252_s21, 0 }
  0x3a   : > { %p993_p13 = scmp.lt.s32.totalorder %s1252_s21, 2  ;;  %p1398_p3 = por %p151_p2, %p37_p12 }
  0x3b   : > { %s1394_s12 = scalar_select %p28_p1, %s1248_s20, %s30_s9  }
  0x3c   : > { %p39_p0 = por %p38_p9, %p37_p12  ;;  %s219_s29 = sand.u32 1, %s1248_s20  }
  0x3d   : > { %s1603_s13 = scalar_select %p1398_p3, 1, 0 }
  0x3e   : > { %s954_s14 = sshll.u32 %s1252_s21, 8  ;;  %s921_s8 = sshll.u32 %s219_s29, 4 }
  0x3f   : > { %s1407_s17 = scalar_lea.hbm %s1588_s0, %s954_s14  ;;  %s223_s23 = scalar_lea.vmem [#allocation2], %s921_s8 }
  0x40   : > { %s230_s27 = sshll.u32 %s223_s23, 4  ;;  %p1409_p11 = pnand %p993_p13, %p39_p0  ;;  %s1413_s27 = int_to_ptr.vmem [resolvable:$true] %s230_s27 }
  0x41   : > { %s1415_s30 = scalar_lea.sflag [#allocation3], %s219_s29  ;;  %s1152_s7 = scalar_lea.hbm %s1407_s17, 256 }
  0x42   : > { %p1153_p2 = scmp.ne.s32.totalorder %s1407_s17, %s1152_s7  ;;  %p1154_p5 = pneg %p1409_p11 }
  0x43   : > { %s1157_s8 = scalar_lea.hbm %s1588_s0, 512  ;;  %p1158_p1 = scmp.lt.s32.totalorder %s1407_s17, %s1588_s0 }
  0x44   : > { %p1155_p10 = pnand %p1154_p5, %p1153_p2  ;;  %p1159_p12 = scmp.lt.s32.totalorder %s1157_s8, %s1152_s7 }
  0x46   : > { %p1156_p7 = pneg %p1155_p10  ;;  %p1160_p9 = por %p1159_p12, %p1158_p1 }
  0x48   : > { %p1161_p13 = pnand %p1160_p9, %p1156_p7 }
  0x4a   : > { %1164 = shalt.err (!%p1161_p13)
}
  0x4b   : > { %s1165_s29 = scalar_lea.vmem %s1413_s27, 256  ;;  %s1261_s23 = smov [#allocation2]  }
  0x4c   : > { %p1166_p0 = scmp.ne.s32.totalorder %s1413_s27, %s1165_s29  ;;  %s1170_s10 = sshll.u32 %s1261_s23, 4  ;;  %s1171_s10 = int_to_ptr.vmem [resolvable:$false] %s1170_s10 }
  0x4d   : > { %s1172_s9 = scalar_lea.vmem %s1171_s10, 512  ;;  %p1173_p10 = scmp.lt.s32.totalorder %s1413_s27, %s1171_s10 }
  0x4e   : > { %p1168_p6 = pnand %p1166_p0, %p1154_p5  ;;  %p1174_p3 = scmp.lt.s32.totalorder %s1172_s9, %s1165_s29 }
  0x50   : > { %p1169_p2 = pneg %p1168_p6  ;;  %p1175_p4 = por %p1174_p3, %p1173_p10 }
  0x52   : > { %p1176_p8 = pnand %p1175_p4, %p1169_p2 }
  0x54   : > { %1179 = shalt.err (!%p1176_p8)
}
  0x55   : > { %s1605_s7 = smov 128   ;;  %p1606_p6 = scmp.ne.s32.totalorder %s1601_s26, 0 }
  0x56   : > { %985 = dma.hbm_to_vmem [thread:$0]  (!%p1409_p11), %s1407_s17, 256, %s1413_s27, %s1415_s30, %s1605_s7, %s1605_s7, %s1258_s11  }
  0x57   : > { %242 = sbr.rel (%p1606_p6) target bundleno = 1335 (0x537), region = 40  ;;  %s1442_s14 = sand.u32 (!%p1606_p6), 1, %s1244_s19  }
  0x58   : > { %s925_s10 = sshll.u32 (!%p1606_p6), %s1442_s14, 4  ;;  %s245_s8 = scalar_lea.sflag (!%p1606_p6), [#allocation3], %s1442_s14 }
  0x59   : > { %s248_s15 = scalar_lea.vmem (!%p1606_p6), [#allocation2], %s925_s10  ;;  %p1607_p4 = scmp.ne.s32.totalorder (!%p1606_p6), %s1599_s24, 0 }
  0x5c   : > { %1223 = dma.done.wait (%p1607_p4), %s245_s8, 256  }
  0x5d   : > { %1225 = vsyncadd (%p1607_p4), %s245_s8, 4294967040  ;;  %p1608_p8 = scmp.eq.s32.totalorder %s1319_s22, 0 }
  0x5f   : > { %1227 = dma.done.wait (%p1608_p8), [#allocation6], 2816   ;;  %p1609_p3 = pmov %p1608_p8 }
  0x61   : > { %1229 = vsyncadd (%p1609_p3), [#allocation6], 4294964480  ;;  %p1610_p11 = pmov %p1609_p3 }
  0x62   : > { %p1611_p5 = pmov %p1609_p3 }
  0x63   : > { %1231 = dma.done.wait (%p1610_p11), [#allocation9], 1536  }
  0x64   : > { %1233 = vsyncadd (%p1611_p5), [#allocation9], 4294965760  ;;  %v290_v0 = vlaneseq  ;;  %v1262_v2 = vmov 0.0   ;;  %v288_v4 = vld [vmem:[%s248_s15] sm:$0xff]  ;;  %v289_v5 = vld [vmem:[%s248_s15 + $0x8] sm:$0xff]  ;;  %s1263_s24 = smov 64  }
  0x65   : > { %302 = vadd.xlane.f32.xlu0 %v288_v4  ;;  %v1042_v43 = vld [vmem:[#allocation7 + $0x74] ss:$8 sps:$4 sm:$0xff]   ;;  %v1044_v44 = vld [vmem:[#allocation7 + $0x70] ss:$8 sps:$4 sm:$0xff]   ;;  %v1045_v45 = vld [vmem:[#allocation7 + $0x64] ss:$8 sps:$4 sm:$0xff]  }
  0x66   : > { %v1459_v1 = vand.u32 127, %v290_v0  ;;  %532 = vmatprep.subr.bf16.mxu0 %v1042_v43  ;;  %v1047_v46 = vld [vmem:[#allocation7 + $0x60] ss:$8 sps:$4 sm:$0xff]   ;;  %v1048_v47 = vld [vmem:[#allocation7 + $0x54] ss:$8 sps:$4 sm:$0xff]   ;;  %s929_s17 = sshll.u32 %s1442_s14, 5 }
  0x67   : > { %533 = vmatpush1.bf16.msra.mxu0 %v1044_v44  ;;  %v1050_v48 = vld [vmem:[#allocation7 + $0x50] ss:$8 sps:$4 sm:$0xff]   ;;  %v1051_v49 = vld [vmem:[#allocation7 + $0x44] ss:$8 sps:$4 sm:$0xff]   ;;  %v1053_v50 = vld [vmem:[#allocation7 + $0x40] ss:$8 sps:$4 sm:$0xff]  }
  0x68   : > { %vm292_vm0 = vcmp.lt.s32.totalorder %v1459_v1, 64  ;;  %534 = vmatprep.subr.bf16.mxu0 %v1045_v45  ;;  %v1054_v51 = vld [vmem:[#allocation7 + $0x34] ss:$8 sps:$4 sm:$0xff]   ;;  %v1056_v52 = vld [vmem:[#allocation7 + $0x30] ss:$8 sps:$4 sm:$0xff]   ;;  %vm660_vm4 = vcmp.lt.s32.totalorder %v1459_v1, 32 }
  0x69   : > { %v1463_v3 = vsel %vm292_vm0, 1.0, %v1262_v2  ;;  %304 = vadd.xlane.f32.xlu0 %v289_v5  ;;  %v1057_v53 = vld [vmem:[#allocation7 + $0x24] ss:$8 sps:$4 sm:$0xff]   ;;  %v1059_v54 = vld [vmem:[#allocation7 + $0x20] ss:$8 sps:$4 sm:$0xff]   ;;  %s955_s27 = sshll.u32 %s1319_s22, 9 }
  0x6a   : > { %v313_v6 = vmul.f32 %v1463_v3, %v288_v4  ;;  %v314_v7 = vmul.f32 %v1463_v3, %v289_v5  ;;  %v330_v26 = vsub.f32 1.0, %v1463_v3  ;;  %s286_s28 = scalar_lea.vmem [#allocation10], %s929_s17  ;;  %s1543_s23 = scalar_lea.hbm %s1593_s5, %s955_s27 }
  0x6b   : > { %535 = vmatpush1.bf16.msra.mxu0 %v1047_v46  ;;  %v1060_v46 = vld [vmem:[#allocation7 + $0x14] ss:$8 sps:$4 sm:$0xff]   ;;  %s813_s30 = sshll.u32 %s286_s28, 4  ;;  %s800_s22 = scalar_lea.sflag [#allocation4], %s1442_s14  ;;  %s1545_s30 = int_to_ptr.vmem [resolvable:$true] %s813_s30 }
  0x6c   : > { %315 = vadd.xlane.f32.xlu1 %v313_v6  ;;  %536 = vmatprep.subr.bf16.mxu0 %v1048_v47  ;;  %v1062_v47 = vld [vmem:[#allocation7 + $0x10] ss:$8 sps:$4 sm:$0xff]   ;;  %s1180_s9 = scalar_lea.vmem %s1545_s30, 512  ;;  %p1612_p1 = scmp.ne.s32.totalorder %s1603_s13, 0 }
  0x6d   : > { %p1181_p7 = scmp.ne.s32.totalorder %s1545_s30, %s1180_s9  ;;  %s1265_s7 = smov [#allocation10]  }
  0x6e   : > { %s1184_s10 = sshll.u32 %s1265_s7, 4  ;;  %s1185_s10 = int_to_ptr.vmem [resolvable:$false] %s1184_s10 }
  0x6f   : > { %537 = vmatpush1.bf16.msra.mxu0 %v1050_v48  ;;  %p1182_p12 = pnand %p1181_p7, %p1612_p1  ;;  %s1186_s8 = scalar_lea.vmem %s1185_s10, 1024 }
  0x70   : > { %317 = vadd.xlane.f32.xlu1 %v314_v7  ;;  %538 = vmatprep.subr.bf16.mxu0 %v1051_v49  ;;  %p1187_p13 = scmp.lt.s32.totalorder %s1545_s30, %s1185_s10  ;;  %p1188_p0 = scmp.lt.s32.totalorder %s1186_s8, %s1180_s9 }
  0x71   : > { %p1183_p9 = pneg %p1182_p12 }
  0x72   : > { %p1189_p2 = por %p1188_p0, %p1187_p13 }
  0x73   : > { %539 = vmatpush1.bf16.msra.mxu0 %v1053_v50 }
  0x74   : > { %540 = vmatprep.subr.bf16.mxu0 %v1054_v51  ;;  %v1063_v51 = vld [vmem:[#allocation7 + $0x4] ss:$8 sps:$4 sm:$0xff]   ;;  %p1190_p10 = pnand %p1189_p2, %p1183_p9 }
  0x77   : > { %541 = vmatpush1.bf16.msra.mxu0 %v1056_v52 }
  0x78   : > { %542 = vmatprep.subr.bf16.mxu0 %v1057_v53 }
  0x7b   : > { %543 = vmatpush1.bf16.msra.mxu0 %v1059_v54 }
  0x7c   : > { %544 = vmatprep.subr.bf16.mxu0 %v1060_v46 }
  0x7f   : > { %545 = vmatpush1.bf16.msra.mxu0 %v1062_v47 }
  0x80   : > { %546 = vmatprep.subr.bf16.mxu0 %v1063_v51 }
  0xee   : > { %v303_v8 = vpop.xlane.xlu0 %302 }
  0xf2   : > { %v305_v10 = vpop.xlane.xlu0 %304 }
  0xf3   : > { %v306_v11 = vadd.f32 %v305_v10, %v303_v8 }
  0xf5   : > { %v316_v9 = vpop.xlane.xlu1 %315  ;;  %v307_v13 = vrot.slane %v306_v11, 4 }
  0xf7   : > { %v308_v15 = vadd.f32 %v307_v13, %v306_v11 }
  0xf9   : > { %v318_v12 = vpop.xlane.xlu1 %317  ;;  %v309_v17 = vrot.slane %v308_v15, 2 }
  0xfa   : > { %v319_v14 = vadd.f32 %v318_v12, %v316_v9 }
  0xfb   : > { %v310_v19 = vadd.f32 %v309_v17, %v308_v15 }
  0xfc   : > { %v320_v16 = vrot.slane %v319_v14, 4 }
  0xfd   : > { %v311_v21 = vrot.slane %v310_v19, 1 }
  0xfe   : > { %v321_v18 = vadd.f32 %v320_v16, %v319_v14 }
  0xff   : > { %v312_v24 = vadd.f32 %v311_v21, %v310_v19 }
 0x100   : > { %v322_v20 = vrot.slane %v321_v18, 2 }
 0x102   : > { %v323_v22 = vadd.f32 %v322_v20, %v321_v18 }
 0x104   : > { %v324_v23 = vrot.slane %v323_v22, 1 }
 0x106   : > { %v325_v25 = vadd.f32 %v324_v23, %v323_v22 }
 0x108   : > { %v326_v27 = vmul.f32 0.0009765625, %v325_v25  ;;  %v327_v28 = vsub.f32 %v312_v24, %v325_v25 }
 0x10a   : > { %v328_v29 = vmul.f32 0.0009765625, %v327_v28  ;;  %v329_v30 = vmul.f32 %v1463_v3, %v326_v27 }
 0x10c   : > { %v331_v31 = vmul.f32 %v330_v26, %v328_v29 }
 0x10e   : > { %v332_v32 = vadd.f32 %v331_v31, %v329_v30 }
 0x110   : > { %v1471_v33 = vsub.f32 %v289_v5, %v332_v32  ;;  %v1473_v34 = vsub.f32 %v288_v4, %v332_v32 }
 0x112   : > { %337 = vrot.lane.b32.xlu1 %v1471_v33, %s1263_s24  ;;  %335 = vrot.lane.b32.xlu0 %v1473_v34, %s1263_s24  ;;  %v340_v35 = vmul.f32 %v1471_v33, %v1471_v33  ;;  %v339_v36 = vmul.f32 %v1473_v34, %v1473_v34 }
 0x114   : > { %v352_v37 = vmul.f32 %v1463_v3, %v339_v36  ;;  %v353_v38 = vmul.f32 %v1463_v3, %v340_v35 }
 0x131   : > { %343 = vadd.xlane.f32.xlu0 %v340_v35 }
 0x135   : > { %354 = vadd.xlane.f32.xlu0 %v352_v37 }
 0x136   : > { %341 = vadd.xlane.f32.xlu1 %v339_v36 }
 0x13a   : > { %356 = vadd.xlane.f32.xlu1 %v353_v38 }
 0x184   : > { %v1485_v39 = vpop.permute.xlu1 %337  ;;  %v1487_v40 = vpop.permute.xlu0 %335 }
 0x185   : > { %v371_v41 = vmul.f32 %v1485_v39, %v1471_v33  ;;  %v370_v42 = vmul.f32 %v1487_v40, %v1473_v34 }
 0x187   : > { %374 = vadd.xlane.f32.xlu1 %v371_v41  ;;  %372 = vadd.xlane.f32.xlu0 %v370_v42 }
 0x1ba   : > { %v344_v56 = vpop.xlane.xlu0 %343 }
 0x1be   : > { %v355_v58 = vpop.xlane.xlu0 %354 }
 0x1bf   : > { %v342_v55 = vpop.xlane.xlu1 %341 }
 0x1c0   : > { %v345_v60 = vadd.f32 %v344_v56, %v342_v55  ;;  %v1065_v55 = vld [vmem:[#allocation7] ss:$8 sps:$4 sm:$0xff]  }
 0x1c1   : > { %547 = vmatpush1.bf16.msra.mxu0 %v1065_v55 }
 0x1c2   : > { %v346_v62 = vrot.slane %v345_v60, 4 }
 0x1c3   : > { %v357_v57 = vpop.xlane.xlu1 %356 }
 0x1c4   : > { %v358_v59 = vadd.f32 %v357_v57, %v355_v58  ;;  %v347_v4 = vadd.f32 %v346_v62, %v345_v60 }
 0x1c6   : > { %v359_v61 = vrot.slane %v358_v59, 4  ;;  %v348_v6 = vrot.slane %v347_v4, 2 }
 0x1c8   : > { %v360_v63 = vadd.f32 %v359_v61, %v358_v59  ;;  %v349_v8 = vadd.f32 %v348_v6, %v347_v4  ;;  %v1264_v59 = vmov 0  }
 0x1c9   : > { %564 = vmatprep.mubr.bf16.mxu0 %v1264_v59 }
 0x1ca   : > { %v361_v5 = vrot.slane %v360_v63, 2  ;;  %v350_v12 = vrot.slane %v349_v8, 1 }
 0x1cc   : > { %v362_v7 = vadd.f32 %v361_v5, %v360_v63  ;;  %v351_v16 = vadd.f32 %v350_v12, %v349_v8  ;;  %v424_v8 = vld [vmem:[#allocation5 + $0x10] sm:$0xff] }
 0x1ce   : > { %v363_v9 = vrot.slane %v362_v7, 1 }
 0x1d0   : > { %v364_v14 = vadd.f32 %v363_v9, %v362_v7  ;;  %v419_v7 = vld [vmem:[#allocation5] sm:$0xff] }
 0x1d2   : > { %v367_v18 = vsub.f32 %v351_v16, %v364_v14  ;;  %v365_v23 = vmul.f32 0.0009765625, %v364_v14 }
 0x1d4   : > { %v368_v21 = vmul.f32 0.0009765625, %v367_v18  ;;  %v366_v28 = vadd.f32 1e-05, %v365_v23  ;;  %v578_v18 = vshrl.u32 %v290_v0, 7 }
 0x1d6   : > { %v369_v25 = vadd.f32 1e-05, %v368_v21  ;;  %v575_v21 = vld [vmem:[%s1591_s3] sm:$0x3] }
 0x1d8   : > { %v385_v30 = vmul.f32 %v369_v25, %v366_v28  ;;  %v395_v42 = vadd.f32 %v369_v25, %v366_v28 }
 0x210   : > { %v375_v10 = vpop.xlane.xlu1 %374  ;;  %v373_v11 = vpop.xlane.xlu0 %372 }
 0x211   : > { %v376_v13 = vadd.f32 %v375_v10, %v373_v11 }
 0x213   : > { %v377_v15 = vrot.slane %v376_v13, 4 }
 0x215   : > { %v378_v17 = vadd.f32 %v377_v15, %v376_v13  ;;  %v432_v13 = vld [vmem:[#allocation5 + $0x28] sm:$0xff] }
 0x217   : > { %v379_v19 = vrot.slane %v378_v17, 2 }
 0x219   : > { %v380_v20 = vadd.f32 %v379_v19, %v378_v17  ;;  %v579_v19 = vsub.s32 0, %v578_v18 }
 0x21b   : > { %v381_v22 = vrot.slane %v380_v20, 1 }
 0x21d   : > { %v382_v24 = vadd.f32 %v381_v22, %v380_v20  ;;  %v583_v20 = vsub.s32 1, %v578_v18  ;;  %v580_v22 = vrot.slane %v575_v21, %v579_v19 }
 0x21f   : > { %v383_v27 = vmul.f32 0.5, %v382_v24  ;;  %v584_v23 = vrot.slane %v575_v21, %v583_v20 }
 0x221   : > { %v384_v29 = vmul.f32 0.0009765625, %v383_v27 }
 0x223   : > { %v386_v31 = vmul.f32 %v384_v29, %v384_v29  ;;  %v404_v52 = vsub.f32 0.0, %v384_v29 }
 0x225   : > { %v387_v32 = vsub.f32 %v385_v30, %v386_v31 }
 0x227   : > { %1066 = vrsqrt.f32 %v387_v32  ;;  %vm390_vm1 = vcmp.eq.f32.partialorder %v387_v32, inf  ;;  %v393_v37 = vand.u32 2147483648, %v387_v32  ;;  %vm392_vm2 = vcmp.eq.f32.partialorder %v387_v32, 0.0 }
 0x234   : > { %v1067_v35 = vpop.eup %1066 }
 0x235   : > { %v389_v36 = vmul.f32 %v1067_v35, %v387_v32 }
 0x237   : > { %v391_v38 = vsel %vm390_vm1, %v387_v32, %v389_v36 }
 0x238   : > { %v394_v41 = vsel %vm392_vm2, %v393_v37, %v391_v38 }
 0x239   : > { %v396_v43 = vmul.f32 2.0, %v394_v41  ;;  %v400_v48 = vadd.f32 %v394_v41, %v369_v25  ;;  %v402_v49 = vadd.f32 %v394_v41, %v366_v28 }
 0x23b   : > { %v397_v44 = vadd.f32 %v396_v43, %v395_v42 }
 0x23d   : > { %v398_v45 = vmul.f32 %v397_v44, %v387_v32 }
 0x23f   : > { %1068 = vrsqrt.f32 %v398_v45 }
 0x24c   : > { %v1069_v50 = vpop.eup %1068 }
 0x24d   : > { %v401_v53 = vmul.f32 %v1069_v50, %v400_v48  ;;  %v403_v54 = vmul.f32 %v1069_v50, %v402_v49  ;;  %v405_v56 = vmul.f32 %v1069_v50, %v404_v52 }
 0x24f   : > { %v406_v57 = vmul.f32 %v1463_v3, %v401_v53  ;;  %v407_v58 = vmul.f32 %v403_v54, %v330_v26  ;;  %v412_v62 = vmul.f32 %v405_v56, %v1485_v39  ;;  %v411_v4 = vmul.f32 %v405_v56, %v1487_v40  ;;  %v420_v3 = vld [vmem:[#allocation5 + $0x8] sm:$0xff]  ;;  %v425_v26 = vld [vmem:[#allocation5 + $0x18] sm:$0xff] }
 0x251   : > { %v408_v60 = vadd.f32 %v407_v58, %v406_v57  ;;  %v295_v57 = vadd.s32 128, %v1459_v1 }
 0x253   : > { %v410_v61 = vmul.f32 %v408_v60, %v1471_v33  ;;  %v409_v63 = vmul.f32 %v408_v60, %v1473_v34  ;;  %v431_v34 = vld [vmem:[#allocation5 + $0x20] sm:$0xff] }
 0x255   : > { %v414_v5 = vadd.f32 %v412_v62, %v410_v61  ;;  %v413_v6 = vadd.f32 %v411_v4, %v409_v63  ;;  %v647_v61 = vand.u32 127, %v295_v57 }
 0x257   : > { %417 = vrot.lane.b32.xlu1 %v414_v5, %s1263_s24  ;;  %415 = vrot.lane.b32.xlu0 %v413_v6, %s1263_s24  ;;  %v422_v11 = vmul.f32 %v420_v3, %v414_v5  ;;  %v421_v12 = vmul.f32 %v419_v7, %v413_v6  ;;  %vm661_vm3 = vcmp.lt.s32.totalorder %v647_v61, 32 }
 0x2c9   : > { %v418_v9 = vpop.permute.xlu1 %417  ;;  %v416_v10 = vpop.permute.xlu0 %415 }
 0x2ca   : > { %v427_v33 = vmul.f32 %v425_v26, %v418_v9  ;;  %v426_v39 = vmul.f32 %v424_v8, %v416_v10  ;;  %v948_v26 = vsel %vm661_vm3, 1.0, %v1262_v2  ;;  %v947_v10 = vsel %vm660_vm4, 1.0, %v1262_v2 }
 0x2cc   : > { %v429_v14 = vadd.f32 %v427_v33, %v422_v11  ;;  %v428_v40 = vadd.f32 %v426_v39, %v421_v12 }
 0x2ce   : > { %v434_v15 = vadd.f32 %v432_v13, %v429_v14  ;;  %v433_v16 = vadd.f32 %v431_v34, %v428_v40 }
 0x2d0   : > { %v435_v17 = vpack.c.bf16 %v434_v15, %v433_v16 }
 0x2d2   : > { %565 = vmatmul.mubr.bf16.vlgmr.msra.gmra.mxu0 %v435_v17 }
 0x392   : > { %v566_v24 = vpop.f32.mrf.mxu0 }
 0x393   : > { %v587_v27 = vadd.f32 %v580_v22, %v566_v24 }
 0x394   : > { %v568_v25 = vpop.f32.mrf.mxu0 }
 0x395   : > { %v588_v28 = vadd.f32 %v584_v23, %v568_v25 }
 0x396   : > { %v570_v29 = vpop.f32.mrf.mxu0 }
 0x397   : > { %v591_v30 = vadd.f32 %v588_v28, %v587_v27  ;;  %v589_v32 = vadd.f32 %v580_v22, %v570_v29  ;;  %v605_v37 = vmul.f32 0.0, %v588_v28 }
 0x398   : > { %v572_v31 = vpop.f32.mrf.mxu0 }
 0x399   : > { %v590_v35 = vadd.f32 %v584_v23, %v572_v31  ;;  %592 = vadd.xlane.f32.xlu1 %v591_v30  ;;  %v608_v41 = vadd.f32 %v605_v37, %v587_v27 }
 0x39b   : > { %v594_v36 = vadd.f32 %v590_v35, %v589_v32  ;;  %v607_v0 = vmul.f32 0.0, %v590_v35 }
 0x39d   : > { %595 = vadd.xlane.f32.xlu0 %v594_v36  ;;  %v611_v38 = vadd.f32 %v607_v0, %v589_v32 }
 0x39f   : > { %612 = vadd.xlane.f32.xlu1 %v611_v38 }
 0x3a1   : > { %609 = vadd.xlane.f32.xlu0 %v608_v41 }
 0x422   : > { %v593_v42 = vpop.xlane.xlu1 %592 }
 0x426   : > { %v596_v43 = vpop.xlane.xlu0 %595 }
 0x427   : > { %v597_v44 = vadd.f32 %v596_v43, %v593_v42 }
 0x428   : > { %v613_v46 = vpop.xlane.xlu1 %612 }
 0x429   : > { %v598_v45 = vrot.slane %v597_v44, 4 }
 0x42a   : > { %v610_v47 = vpop.xlane.xlu0 %609 }
 0x42b   : > { %v599_v48 = vadd.f32 %v598_v45, %v597_v44  ;;  %v614_v49 = vadd.f32 %v613_v46, %v610_v47 }
 0x42d   : > { %v600_v50 = vrot.slane %v599_v48, 2  ;;  %v615_v51 = vrot.slane %v614_v49, 4 }
 0x42f   : > { %v601_v52 = vadd.f32 %v600_v50, %v599_v48  ;;  %v616_v53 = vadd.f32 %v615_v51, %v614_v49 }
 0x431   : > { %v617_v54 = vrot.slane %v616_v53, 2  ;;  %v602_v55 = vrot.slane %v601_v52, 1 }
 0x433   : > { %v618_v56 = vadd.f32 %v617_v54, %v616_v53  ;;  %v603_v59 = vadd.f32 %v602_v55, %v601_v52 }
 0x435   : > { %v619_v58 = vrot.slane %v618_v56, 1 }
 0x437   : > { %v620_v60 = vadd.f32 %v619_v58, %v618_v56 }
 0x439   : > { %v621_v62 = vmul.f32 0.001953125, %v620_v60  ;;  %v622_v63 = vsub.f32 %v603_v59, %v620_v60 }
 0x43b   : > { %v623_v4 = vmul.f32 0.001953125, %v622_v63  ;;  %v625_v5 = vmul.f32 0.0, %v621_v62 }
 0x43d   : > { %v628_v6 = vmul.f32 0.0, %v623_v4  ;;  %v631_v3 = vadd.f32 %v625_v5, %v623_v4 }
 0x43f   : > { %v630_v7 = vadd.f32 %v628_v6, %v621_v62  ;;  %v633_v8 = vsub.f32 %v588_v28, %v631_v3  ;;  %v635_v9 = vsub.f32 %v590_v35, %v631_v3 }
 0x441   : > { %v632_v11 = vsub.f32 %v587_v27, %v630_v7  ;;  %v634_v33 = vsub.f32 %v589_v32, %v630_v7  ;;  %v1510_v12 = vmul.f32 %v948_v26, %v635_v9  ;;  %v1512_v39 = vmul.f32 %v948_v26, %v633_v8 }
 0x443   : > { %v1514_v13 = vmul.f32 %v947_v10, %v634_v33  ;;  %v673_v34 = vmul.f32 %v1510_v12, %v1510_v12  ;;  %v1518_v14 = vmul.f32 %v947_v10, %v632_v11  ;;  %v671_v1 = vmul.f32 %v1512_v39, %v1512_v39 }
 0x445   : > { %v672_v40 = vmul.f32 %v1514_v13, %v1514_v13  ;;  %v670_v2 = vmul.f32 %v1518_v14, %v1518_v14  ;;  %v690_v17 = vmul.f32 0.0, %v673_v34  ;;  %v688_v18 = vmul.f32 0.0, %v671_v1 }
 0x446   : > { %v710_v21 = vmul.f32 %v1510_v12, %v1514_v13  ;;  %v709_v22 = vmul.f32 %v1512_v39, %v1518_v14 }
 0x447   : > { %v677_v15 = vadd.f32 %v673_v34, %v672_v40  ;;  %v674_v16 = vadd.f32 %v671_v1, %v670_v2  ;;  %v694_v19 = vadd.f32 %v690_v17, %v672_v40  ;;  %v691_v20 = vadd.f32 %v688_v18, %v670_v2 }
 0x448   : > { %v714_v23 = vadd.f32 %v710_v21, %v710_v21  ;;  %v711_v24 = vadd.f32 %v709_v22, %v709_v22 }
 0x449   : > { %678 = vadd.xlane.f32.xlu1 %v677_v15  ;;  %675 = vadd.xlane.f32.xlu0 %v674_v16 }
 0x44d   : > { %695 = vadd.xlane.f32.xlu1 %v694_v19  ;;  %692 = vadd.xlane.f32.xlu0 %v691_v20 }
 0x451   : > { %715 = vadd.xlane.f32.xlu1 %v714_v23  ;;  %712 = vadd.xlane.f32.xlu0 %v711_v24 }
 0x4d2   : > { %v679_v25 = vpop.xlane.xlu1 %678  ;;  %v676_v27 = vpop.xlane.xlu0 %675 }
 0x4d3   : > { %v680_v28 = vadd.f32 %v679_v25, %v676_v27  ;;  %v765_v27 = vld [vmem:[#allocation8] sm:$0xff] }
 0x4d5   : > { %v681_v29 = vrot.slane %v680_v28, 4 }
 0x4d6   : > { %v696_v30 = vpop.xlane.xlu1 %695  ;;  %v693_v31 = vpop.xlane.xlu0 %692 }
 0x4d7   : > { %v682_v32 = vadd.f32 %v681_v29, %v680_v28  ;;  %v697_v35 = vadd.f32 %v696_v30, %v693_v31  ;;  %v766_v28 = vld [vmem:[#allocation8 + $0x8] sm:$0xff] }
 0x4d9   : > { %v683_v36 = vrot.slane %v682_v32, 2  ;;  %v698_v0 = vrot.slane %v697_v35, 4 }
 0x4da   : > { %v716_v37 = vpop.xlane.xlu1 %715  ;;  %v713_v38 = vpop.xlane.xlu0 %712 }
 0x4db   : > { %v684_v41 = vadd.f32 %v683_v36, %v682_v32  ;;  %v699_v42 = vadd.f32 %v698_v0, %v697_v35  ;;  %v717_v43 = vadd.f32 %v716_v37, %v713_v38  ;;  %v767_v35 = vld [vmem:[#allocation8 + $0x10] sm:$0xff]  ;;  %v768_v36 = vld [vmem:[#allocation8 + $0x18] sm:$0xff]  ;;  %v774_v0 = vld [vmem:[#allocation8 + $0x20] sm:$0xff] }
 0x4dc   : > { %v775_v37 = vld [vmem:[#allocation8 + $0x28] sm:$0xff]  ;;  %v776_v38 = vld [vmem:[#allocation8 + $0x30] sm:$0xff] }
 0x4dd   : > { %v700_v44 = vrot.slane %v699_v42, 2  ;;  %v718_v45 = vrot.slane %v717_v43, 4  ;;  %v685_v46 = vrot.slane %v684_v41, 1 }
 0x4df   : > { %v701_v47 = vadd.f32 %v700_v44, %v699_v42  ;;  %v719_v48 = vadd.f32 %v718_v45, %v717_v43  ;;  %v686_v51 = vadd.f32 %v685_v46, %v684_v41  ;;  %v777_v41 = vld [vmem:[#allocation8 + $0x38] sm:$0xff] }
 0x4e1   : > { %v702_v49 = vrot.slane %v701_v47, 1  ;;  %v720_v50 = vrot.slane %v719_v48, 2 }
 0x4e3   : > { %v703_v52 = vadd.f32 %v702_v49, %v701_v47  ;;  %v721_v53 = vadd.f32 %v720_v50, %v719_v48 }
 0x4e5   : > { %v706_v54 = vsub.f32 %v686_v51, %v703_v52  ;;  %v722_v55 = vrot.slane %v721_v53, 1  ;;  %v704_v56 = vmul.f32 0.001953125, %v703_v52  ;;  %v788_v51 = vld [vmem:[#allocation8 + $0x48] sm:$0xff]  ;;  %v789_v52 = vld [vmem:[#allocation8 + $0x50] sm:$0xff] }
 0x4e7   : > { %v707_v57 = vmul.f32 0.001953125, %v706_v54  ;;  %v723_v58 = vadd.f32 %v722_v55, %v721_v53  ;;  %v705_v61 = vadd.f32 1e-05, %v704_v56  ;;  %v790_v53 = vld [vmem:[#allocation8 + $0x58] sm:$0xff] }
 0x4e9   : > { %v708_v59 = vadd.f32 1e-05, %v707_v57  ;;  %v724_v60 = vmul.f32 0.5, %v723_v58 }
 0x4eb   : > { %v725_v62 = vmul.f32 0.001953125, %v724_v60  ;;  %v726_v63 = vmul.f32 %v708_v59, %v705_v61  ;;  %v736_v9 = vadd.f32 %v708_v59, %v705_v61 }
 0x4ed   : > { %v727_v4 = vmul.f32 %v725_v62, %v725_v62  ;;  %v745_v2 = vsub.f32 0.0, %v725_v62 }
 0x4ef   : > { %v728_v5 = vsub.f32 %v726_v63, %v727_v4 }
 0x4f1   : > { %1070 = vrsqrt.f32 %v728_v5  ;;  %vm731_vm5 = vcmp.eq.f32.partialorder %v728_v5, inf  ;;  %v734_v26 = vand.u32 2147483648, %v728_v5  ;;  %vm733_vm6 = vcmp.eq.f32.partialorder %v728_v5, 0.0 }
 0x4fe   : > { %v1071_v6 = vpop.eup %1070 }
 0x4ff   : > { %v730_v3 = vmul.f32 %v1071_v6, %v728_v5 }
 0x501   : > { %v732_v7 = vsel %vm731_vm5, %v728_v5, %v730_v3 }
 0x502   : > { %v735_v8 = vsel %vm733_vm6, %v734_v26, %v732_v7 }
 0x503   : > { %v737_v10 = vmul.f32 2.0, %v735_v8  ;;  %v741_v34 = vadd.f32 %v735_v8, %v708_v59  ;;  %v743_v1 = vadd.f32 %v735_v8, %v705_v61 }
 0x505   : > { %v738_v11 = vadd.f32 %v737_v10, %v736_v9 }
 0x507   : > { %v739_v33 = vmul.f32 %v738_v11, %v728_v5 }
 0x509   : > { %1072 = vrsqrt.f32 %v739_v33 }
 0x516   : > { %v1073_v40 = vpop.eup %1072 }
 0x517   : > { %v742_v15 = vmul.f32 %v1073_v40, %v741_v34  ;;  %v744_v16 = vmul.f32 %v1073_v40, %v743_v1  ;;  %v746_v17 = vmul.f32 %v1073_v40, %v745_v2 }
 0x519   : > { %v748_v18 = vmul.f32 0.0, %v742_v15  ;;  %v749_v19 = vmul.f32 0.0, %v744_v16  ;;  %v757_v22 = vmul.f32 %v746_v17, %v1512_v39  ;;  %v758_v23 = vmul.f32 %v746_v17, %v1518_v14 }
 0x51a   : > { %v759_v24 = vmul.f32 %v746_v17, %v1510_v12  ;;  %v760_v25 = vmul.f32 %v746_v17, %v1514_v13 }
 0x51b   : > { %v751_v20 = vadd.f32 %v749_v19, %v742_v15  ;;  %v752_v21 = vadd.f32 %v748_v18, %v744_v16 }
 0x51d   : > { %v753_v29 = vmul.f32 %v751_v20, %v1518_v14  ;;  %v754_v30 = vmul.f32 %v752_v21, %v1512_v39  ;;  %v755_v31 = vmul.f32 %v751_v20, %v1514_v13  ;;  %v756_v32 = vmul.f32 %v752_v21, %v1510_v12  ;;  %v787_v39 = vld [vmem:[#allocation8 + $0x40] sm:$0xff] }
 0x51f   : > { %v761_v42 = vadd.f32 %v757_v22, %v753_v29  ;;  %v762_v43 = vadd.f32 %v758_v23, %v754_v30  ;;  %v763_v44 = vadd.f32 %v759_v24, %v755_v31  ;;  %v764_v45 = vadd.f32 %v760_v25, %v756_v32 }
 0x521   : > { %v769_v46 = vmul.f32 %v765_v27, %v761_v42  ;;  %v770_v47 = vmul.f32 %v766_v28, %v762_v43  ;;  %v771_v14 = vmul.f32 %v767_v35, %v763_v44  ;;  %v772_v48 = vmul.f32 %v768_v36, %v764_v45 }
 0x522   : > { %v778_v49 = vmul.f32 %v774_v0, %v762_v43  ;;  %v779_v13 = vmul.f32 %v775_v37, %v761_v42  ;;  %v780_v50 = vmul.f32 %v776_v38, %v764_v45  ;;  %v781_v12 = vmul.f32 %v777_v41, %v763_v44 }
 0x524   : > { %v782_v54 = vadd.f32 %v778_v49, %v769_v46  ;;  %v783_v55 = vadd.f32 %v779_v13, %v770_v47  ;;  %v784_v56 = vadd.f32 %v780_v50, %v771_v14  ;;  %v785_v57 = vadd.f32 %v781_v12, %v772_v48 }
 0x526   : > { %v791_v58 = vadd.f32 %v787_v39, %v782_v54  ;;  %v792_v59 = vadd.f32 %v788_v51, %v783_v55  ;;  %v793_v60 = vadd.f32 %v789_v52, %v784_v56  ;;  %v794_v61 = vadd.f32 %v790_v53, %v785_v57 }
 0x528   : > { %795 = vst [vmem:[%s286_s28] sm:$0xff] %v791_v58  ;;  %796 = vst [vmem:[%s286_s28 + $0x8] sm:$0xff] %v792_v59 }
 0x529   : > { %797 = vst [vmem:[%s286_s28 + $0x10] sm:$0xff] %v793_v60  ;;  %798 = vst [vmem:[%s286_s28 + $0x18] sm:$0xff] %v794_v61 }
 0x52a   : > { %1193 = shalt.err (!%p1190_p10)
}
 0x52b   : > { %s1194_s15 = scalar_lea.hbm %s1543_s23, 512  ;;  %s1198_s11 = scalar_lea.hbm %s1593_s5, 1024 }
 0x52c   : > { %p1195_p6 = scmp.ne.s32.totalorder %s1543_s23, %s1194_s15  ;;  %p1199_p3 = scmp.lt.s32.totalorder %s1543_s23, %s1593_s5 }
 0x52d   : > { %p1200_p11 = scmp.lt.s32.totalorder %s1198_s11, %s1194_s15 }
 0x52e   : > { %p1196_p4 = pnand %p1195_p6, %p1612_p1 }
 0x52f   : > { %p1201_p5 = por %p1200_p11, %p1199_p3 }
 0x530   : > { %p1197_p8 = pneg %p1196_p4 }
 0x532   : > { %p1202_p7 = pnand %p1201_p5, %p1197_p8 }
 0x534   : > { %1205 = shalt.err (!%p1202_p7)
}
 0x535   : > { %s1266_s28 = smov 256   ;;  %s1267_s16 = smov 16  }
 0x536   : > { %970 = dma.vmem_to_hbm [thread:$0]  (%p1612_p1), %s1545_s30, 512, %s1543_s23, %s800_s22, %s1266_s28, %s1266_s28, %s1267_s16  }
 0x537 PF: > { %s828_s29 = sand.u32 1, %s1240_s18   ;;  %p1613_p12 = scmp.ne.s32.totalorder %s1600_s25, 0 }
 0x538   : > { %p1614_p9 = scmp.ge.s32.totalorder %s1252_s21, 2  ;;  %s829_s9 = scalar_lea.sflag [#allocation4], %s828_s29 }
 0x53a   : > { %p987_p13 = pnand %p1614_p9, %p1613_p12 }
 0x53c   : > { %p988_p0 = pneg %p987_p13 }
 0x53e   : > { %1235 = dma.done.wait (%p988_p0), %s829_s9, 512  }
 0x53f   : > { %1237 = vsyncadd (%p988_p0), %s829_s9, 4294966784  ;;  %p20_p2 = scmp.ge.s32.totalorder %s1384_s6, 4   ;;  %s1615_s18 = smov %s1244_s19 }
 0x540   : > { %s1616_s19 = smov %s1248_s20  ;;  %s1617_s20 = smov %s1394_s12 }
 0x541   : > { %s1618_s21 = smov %s1384_s6  ;;  %22 = sbr.rel (!%p20_p2) target bundleno = 7 (0x7), region = 101 }
 0x546   :  { %834 = vsyncpa [#allocation3], 1 }
 0x547   :  { %836 = vsyncpa [#allocation3 + $0x1], 1 }
 0x548   :  { %837 = vsyncpa [#allocation6], 1 }
 0x549   :  { %838 = vsyncpa [#allocation9], 1 }
 0x54a   :  { %839 = vsyncpa [#allocation4], 1 }
 0x54b   :  { %841 = vsyncpa [#allocation4 + $0x1], 1 }

</bundles_post_ra>
